<compile_context>
chip_gen: v7x
topology: tpu7x:2x2x1
jax: 0.10.0
libtpu: 0.0.40
codegen_flags: <defaults>
</compile_context>

<pallas_src>
import math
import functools

import jax
import jax.numpy as jnp
from jax.experimental import pallas as pl
from jax.experimental.pallas import tpu as pltpu


# ----------------------------------------------------------------------------
# Helpers
# ----------------------------------------------------------------------------

def _round_up(x, m):
    return (x + m - 1) // m * m


def _vmem_capacity_bytes():
    """Per-core VMEM capacity (128 MiB on v5e/v6e, 64 MiB on v7x); conservative fallback."""
    try:
        return int(pltpu.get_tpu_info().vmem_capacity_bytes)
    except Exception:
        return 64 << 20


def _pick_batch_tile(batch, seq, dim, budget_bytes, weight_bytes):
    """Largest batch tile whose activations + double-buffered stacked-layer weights fit.

    Candidates must divide `batch` and give a row count that is a multiple of 8 (the
    (8, 128) tiling rule), unless the candidate is the full batch (block == full dim).
    Falls back to the smallest valid candidate instead of silently jumping to full batch.
    """
    layer_w = 2 * (12 * dim * dim) * weight_bytes          # 2x-buffered per-layer matrices
    valid = [c for c in range(1, batch + 1)
             if batch % c == 0 and (c == batch or (c * seq) % 8 == 0)]
    fitting = []
    for c in valid:
        rows = c * seq
        act = rows * dim * 4 * 18 + c * seq * seq * 4 * 3  # f32 slabs + per-head score tiles
        if act + layer_w <= budget_bytes:
            fitting.append(c)
    return max(fitting) if fitting else min(valid)


def _layer_spec(a):
    """BlockSpec for a weight stacked on a leading layer axis: one layer per grid step."""
    nd = a.ndim
    return pl.BlockSpec(
        (pl.Squeezed(),) + tuple(a.shape[1:]),
        lambda b, l, _nd=nd: (l,) + (0,) * (_nd - 1),
    )


# ----------------------------------------------------------------------------
# Kernel 1: all attention blocks + final LayerNorm fused; residual stream lives in out_ref
# ----------------------------------------------------------------------------

def _blocks_kernel(x_ref, ln1_g_ref, ln1_b_ref, wqkv_ref, bqkv_ref,
                   wo_ref, bo_ref, ln2_g_ref, ln2_b_ref,
                   w1_ref, b1_ref, w2_ref, b2_ref,
                   lnf_g_ref, lnf_b_ref,
                   out_ref, attn_scr,
                   *, num_heads, seq_len, compute_dtype):
    """Grid = (batch_tiles, num_layers).  out_ref (rows, D) f32 carries x across layers."""
    eps = 1e-5
    layer = pl.program_id(1)
    n_layers = pl.num_programs(1)
    cd = compute_dtype

    @pl.when(layer == 0)
    def _():
        out_ref[...] = x_ref[...].astype(jnp.float32)

    x = out_ref[...]                                 # (rows, D) f32 residual stream
    rows, D = x.shape
    S = seq_len
    bb = rows // S
    H = num_heads
    hd = D // H

    def layer_norm(v, g, b):
        mu = jnp.mean(v, axis=-1, keepdims=True)
        var = jnp.mean((v - mu) ** 2, axis=-1, keepdims=True)
        return (v - mu) * jax.lax.rsqrt(var + eps) * g + b

    # ---- multi-head self-attention (1/sqrt(hd) scale folded into W_q at init time) ----
    xn = layer_norm(x, ln1_g_ref[...], ln1_b_ref[...])
    qkv = (jnp.dot(xn.astype(cd), wqkv_ref[...].astype(cd),
                   preferred_element_type=jnp.float32) + bqkv_ref[...])   # (rows, 3D) f32

    # Additive float tril mask (PyTorch float attn_mask semantics: scores + mask),
    # built in-kernel and broadcast to the batched score shape ONCE per layer.
    r_idx = jax.lax.broadcasted_iota(jnp.int32, (S, S), 0)
    c_idx = jax.lax.broadcasted_iota(jnp.int32, (S, S), 1)
    add_mask = jnp.broadcast_to(
        (r_idx >= c_idx).astype(jnp.float32)[None], (bb, S, S))           # (bb, S, S)

    for h in range(H):                # static unroll; each head is batched over bb sequences
        lo = h * hd
        qh = qkv[:, lo:lo + hd].reshape(bb, S, hd).astype(cd)
        kh = qkv[:, D + lo:D + lo + hd].reshape(bb, S, hd).astype(cd)
        vh = qkv[:, 2 * D + lo:2 * D + lo + hd].reshape(bb, S, hd).astype(cd)

        s = jnp.einsum('bqd,bkd->bqk', qh, kh,
                       preferred_element_type=jnp.float32) + add_mask
        s = s - jnp.max(s, axis=-1, keepdims=True)
        p = jnp.exp(s)
        p = p * pl.reciprocal(jnp.sum(p, axis=-1, keepdims=True), approx=True)

        oh = jnp.einsum('bqk,bkd->bqd', p.astype(cd), vh,
                        preferred_element_type=jnp.float32)               # (bb, S, hd)
        # concat(heads): cheap lane stores into a VMEM scratch; one K=D W_o matmul below.
        attn_scr[:, lo:lo + hd] = oh.reshape(rows, hd).astype(attn_scr.dtype)

    attn = jnp.dot(attn_scr[...], wo_ref[...].astype(cd),
                   preferred_element_type=jnp.float32) + bo_ref[...]
    x1 = x + attn                                    # residual (dropout == identity in eval)

    # ---- feed-forward ----
    x1n = layer_norm(x1, ln2_g_ref[...], ln2_b_ref[...])
    h1 = jnp.maximum(jnp.dot(x1n.astype(cd), w1_ref[...].astype(cd),
                             preferred_element_type=jnp.float32) + b1_ref[...], 0.0)
    ff = jnp.dot(h1.astype(cd), w2_ref[...].astype(cd),
                 preferred_element_type=jnp.float32) + b2_ref[...]
    x2 = x1 + ff

    @pl.when(layer < n_layers - 1)
    def _():
        out_ref[...] = x2

    @pl.when(layer == n_layers - 1)
    def _():
        # Fused final LayerNorm epilogue (so the logits kernel is a pure matmul).
        out_ref[...] = layer_norm(x2, lnf_g_ref[...], lnf_b_ref[...]).astype(out_ref.dtype)


def run_attention_blocks(x, p, *, num_heads, seq_len, compute_dtype):
    """x: (B*S, D) flat activations; returns (B*S, D) = final-LayerNorm'd residual stream."""
    M, D = x.shape
    B = M // seq_len
    L = p["blk_w_qkv"].shape[0]
    wbytes = jnp.dtype(p["blk_w_qkv"].dtype).itemsize

    cap = _vmem_capacity_bytes()
    bb = _pick_batch_tile(B, seq_len, D, int(cap * 0.65), wbytes)
    rows = bb * seq_len
    grid = (B // bb, L)

    x_spec = pl.BlockSpec((rows, D), lambda b, l: (b, 0))
    lnf_spec = pl.BlockSpec((1, D), lambda b, l: (0, 0))

    weight_keys = ["blk_ln1_g", "blk_ln1_b", "blk_w_qkv", "blk_b_qkv",
                   "blk_w_o", "blk_b_o", "blk_ln2_g", "blk_ln2_b",
                   "blk_w_ff1", "blk_b_ff1", "blk_w_ff2", "blk_b_ff2"]

    return pl.pallas_call(
        functools.partial(_blocks_kernel, num_heads=num_heads,
                          seq_len=seq_len, compute_dtype=compute_dtype),
        out_shape=jax.ShapeDtypeStruct((M, D), jnp.float32),
        grid=grid,
        in_specs=[x_spec] + [_layer_spec(p[k]) for k in weight_keys] + [lnf_spec, lnf_spec],
        out_specs=x_spec,
        scratch_shapes=[pltpu.VMEM((rows, D), compute_dtype)],   # per-head output concat slab
        compiler_params=pltpu.CompilerParams(
            dimension_semantics=("parallel", "arbitrary"),
            vmem_limit_bytes=int(cap * 0.9)),
    )(x, *[p[k] for k in weight_keys], p["lnf_g"], p["lnf_b"])


# ----------------------------------------------------------------------------
# Kernel 2: output projection (matmul + bias), tiled over rows and num_items
# ----------------------------------------------------------------------------

def _logits_kernel(x_ref, w_ref, b_ref, out_ref, *, compute_dtype):
    out_ref[...] = (jnp.dot(x_ref[...].astype(compute_dtype),
                            w_ref[...].astype(compute_dtype),
                            preferred_element_type=jnp.float32)
                    + b_ref[...]).astype(out_ref.dtype)


def run_logits(x, params, compute_dtype=jnp.bfloat16):
    """x: (M, D) final-LayerNorm'd activations; returns (M, num_items) f32 logits."""
    M, D = x.shape
    w = params["w_out"]
    b = params["b_out"]
    N = w.shape[1]

    # Row tiling (large tiles amortize w_out re-streaming from HBM).
    if M > 512:
        tm = 512
        M_pad = _round_up(M, tm)
        x = jnp.pad(x, ((0, M_pad - M), (0, 0)))
    else:
        tm, M_pad = M, M

    # Lane-dense num_items tiling (multiple of 128 -> unmasked vst output path).
    tn = min(_round_up(N, 128), 1024)
    N_pad = _round_up(N, tn)
    if N_pad != N:
        w = jnp.pad(w, ((0, 0), (0, N_pad - N)))
        b = jnp.pad(b, ((0, 0), (0, N_pad - N)))

    grid = (M_pad // tm, N_pad // tn)
    cap = _vmem_capacity_bytes()
    out = pl.pallas_call(
        functools.partial(_logits_kernel, compute_dtype=compute_dtype),
        out_shape=jax.ShapeDtypeStruct((M_pad, N_pad), jnp.float32),
        grid=grid,
        in_specs=[
            pl.BlockSpec((tm, D), lambda i, j: (i, 0)),
            pl.BlockSpec((D, tn), lambda i, j: (0, j)),
            pl.BlockSpec((1, tn), lambda i, j: (0, j)),
        ],
        out_specs=pl.BlockSpec((tm, tn), lambda i, j: (i, j)),
        compiler_params=pltpu.CompilerParams(
            dimension_semantics=("parallel", "parallel"),
            vmem_limit_bytes=int(cap * 0.9)),
    )(x, w, b)
    return out[:M, :N]


# ----------------------------------------------------------------------------
# Parameter init (deterministic, xavier-normal like the PyTorch _init_weights)
# ----------------------------------------------------------------------------

def _xavier_normal(key, shape):
    fan_a, fan_b = shape[0], shape[-1]
    std = math.sqrt(2.0 / (fan_a + fan_b))
    return std * jax.random.normal(key, shape, dtype=jnp.float32)


def init_params(key, *, num_items, embedding_dim, num_heads, num_blocks, max_seq_len,
                weight_dtype=jnp.bfloat16):
    """Kernel-ready params: big matrices in `weight_dtype` (bf16 by default), biases/LN f32.

    The 1/sqrt(head_dim) attention scale is folded into W_q (and its bias) here so the
    kernel never multiplies the scores by the scale.
    """
    D = embedding_dim
    L = num_blocks
    hd = D // num_heads
    scale = 1.0 / math.sqrt(hd)
    keys = iter(jax.random.split(key, 4 + 6 * L))

    def xav(shape):
        return _xavier_normal(next(keys), shape)

    def qkv_weight():
        wq = xav((D, D)) * scale        # attention scale folded into W_q (b_q is zero)
        wk = xav((D, D))
        wv = xav((D, D))
        return jnp.concatenate([wq, wk, wv], axis=1)

    params = {
        # embeddings (xavier_normal_ overwrites padding_idx row in the reference too)
        "item_emb": xav((num_items + 1, D)),
        "pos_emb": xav((max_seq_len, D)),
        # final LayerNorm (fused into the blocks kernel) + output Linear(D, num_items)
        "lnf_g": jnp.ones((1, D), jnp.float32),
        "lnf_b": jnp.zeros((1, D), jnp.float32),
        "w_out": xav((D, num_items)).astype(weight_dtype),
        "b_out": jnp.zeros((1, num_items), jnp.float32),
        # per-block weights, stacked on a leading layer axis (layer-by-layer DMA in kernel)
        "blk_ln1_g": jnp.ones((L, 1, D), jnp.float32),
        "blk_ln1_b": jnp.zeros((L, 1, D), jnp.float32),
        "blk_w_qkv": jnp.stack([qkv_weight() for _ in range(L)]).astype(weight_dtype),
        "blk_b_qkv": jnp.zeros((L, 1, 3 * D), jnp.float32),
        "blk_w_o": jnp.stack([xav((D, D)) for _ in range(L)]).astype(weight_dtype),
        "blk_b_o": jnp.zeros((L, 1, D), jnp.float32),
        "blk_ln2_g": jnp.ones((L, 1, D), jnp.float32),
        "blk_ln2_b": jnp.zeros((L, 1, D), jnp.float32),
        "blk_w_ff1": jnp.stack([xav((D, 4 * D)) for _ in range(L)]).astype(weight_dtype),
        "blk_b_ff1": jnp.zeros((L, 1, 4 * D), jnp.float32),
        "blk_w_ff2": jnp.stack([xav((4 * D, D)) for _ in range(L)]).astype(weight_dtype),
        "blk_b_ff2": jnp.zeros((L, 1, D), jnp.float32),
    }
    return params


# ----------------------------------------------------------------------------
# Forward pass (glue in plain JAX; hot path in the two Pallas kernels)
# ----------------------------------------------------------------------------

def forward(params, sequences, num_heads, compute_dtype=jnp.bfloat16):
    B, S = sequences.shape
    D = params["item_emb"].shape[1]
    item_emb = jnp.take(params["item_emb"], sequences, axis=0)       # (B, S, D)
    pos_emb = params["pos_emb"][:S][None, :, :]                      # (1, S, D)
    x = (item_emb + pos_emb).astype(jnp.float32).reshape(B * S, D)   # dropout == identity
    x = run_attention_blocks(x, params, num_heads=num_heads, seq_len=S,
                             compute_dtype=compute_dtype)            # (B*S, D), final-LN'd
    logits = run_logits(x, params, compute_dtype=compute_dtype)      # (B*S, num_items)
    return logits.reshape(B, S, -1)


if __name__ == "__main__":
    # Small, module-consistent shapes.
    B, S = 2, 8
    num_items = 64
    embedding_dim = 32
    num_heads = 4
    num_blocks = 2
    max_seq_len = 16

    key = jax.random.PRNGKey(0)
    k_param, k_seq = jax.random.split(key)
    params = init_params(k_param, num_items=num_items, embedding_dim=embedding_dim,
                         num_heads=num_heads, num_blocks=num_blocks,
                         max_seq_len=max_seq_len)
    sequences = jax.random.randint(k_seq, (B, S), 0, num_items + 1, dtype=jnp.int32)

    logits = forward(params, sequences, num_heads)
    jax.block_until_ready(logits)
    assert logits.shape == (B, S, num_items)
    assert bool(jnp.all(jnp.isfinite(logits)))
    print("KERNEL_OK")
</pallas_src>

<mosaic_0001>
module attributes {stable_mosaic.version = 11 : i64} {
  func.func @_blocks_kernel(%arg0: i32, %arg1: i32, %arg2: memref<16x32xf32, #tpu.memory_space<vmem>>, %arg3: memref<1x1x32xf32, #tpu.memory_space<vmem>>, %arg4: memref<1x1x32xf32, #tpu.memory_space<vmem>>, %arg5: memref<1x32x96xbf16, #tpu.memory_space<vmem>>, %arg6: memref<1x1x96xf32, #tpu.memory_space<vmem>>, %arg7: memref<1x32x32xbf16, #tpu.memory_space<vmem>>, %arg8: memref<1x1x32xf32, #tpu.memory_space<vmem>>, %arg9: memref<1x1x32xf32, #tpu.memory_space<vmem>>, %arg10: memref<1x1x32xf32, #tpu.memory_space<vmem>>, %arg11: memref<1x32x128xbf16, #tpu.memory_space<vmem>>, %arg12: memref<1x1x128xf32, #tpu.memory_space<vmem>>, %arg13: memref<1x128x32xbf16, #tpu.memory_space<vmem>>, %arg14: memref<1x1x32xf32, #tpu.memory_space<vmem>>, %arg15: memref<1x32xf32, #tpu.memory_space<vmem>>, %arg16: memref<1x32xf32, #tpu.memory_space<vmem>>, %arg17: memref<16x32xf32, #tpu.memory_space<vmem>>, %arg18: memref<16x32xbf16, #tpu.memory_space<vmem>>) attributes {dimension_semantics = [#tpu.dimension_semantics<parallel>, #tpu.dimension_semantics<arbitrary>], iteration_bounds = array<i64: 1, 2>, scalar_prefetch = 0 : i64, scratch_operands = 1 : i64, tpu.core_type = #tpu.core_type<tc>, window_params = [{transform_indices = @transform_0, window_bounds = array<i64: 16, 32>}, {transform_indices = @transform_1, window_bounds = array<i64: 1, 1, 32>}, {transform_indices = @transform_2, window_bounds = array<i64: 1, 1, 32>}, {transform_indices = @transform_3, window_bounds = array<i64: 1, 32, 96>}, {transform_indices = @transform_4, window_bounds = array<i64: 1, 1, 96>}, {transform_indices = @transform_5, window_bounds = array<i64: 1, 32, 32>}, {transform_indices = @transform_6, window_bounds = array<i64: 1, 1, 32>}, {transform_indices = @transform_7, window_bounds = array<i64: 1, 1, 32>}, {transform_indices = @transform_8, window_bounds = array<i64: 1, 1, 32>}, {transform_indices = @transform_9, window_bounds = array<i64: 1, 32, 128>}, {transform_indices = @transform_10, window_bounds = array<i64: 1, 1, 128>}, {transform_indices = @transform_11, window_bounds = array<i64: 1, 128, 32>}, {transform_indices = @transform_12, window_bounds = array<i64: 1, 1, 32>}, {pipeline_mode = #tpu.pipeline_mode<synchronous>, transform_indices = @transform_13, window_bounds = array<i64: 1, 32>}, {pipeline_mode = #tpu.pipeline_mode<synchronous>, transform_indices = @transform_14, window_bounds = array<i64: 1, 32>}, {transform_indices = @transform_15, window_bounds = array<i64: 16, 32>}]} {
    %c0_i32 = arith.constant 0 : i32
    %0 = arith.cmpi eq, %arg1, %c0_i32 : i32
    %1 = arith.extui %0 : i1 to i32
    %c0_i32_0 = arith.constant 0 : i32
    %2 = arith.cmpi ne, %1, %c0_i32_0 : i32
    scf.if %2 {
      %c0_78 = arith.constant 0 : index
      %c0_79 = arith.constant 0 : index
      %210 = vector.load %arg2[%c0_78, %c0_79] : memref<16x32xf32, #tpu.memory_space<vmem>>, vector<16x32xf32>
      %c0_80 = arith.constant 0 : index
      %c0_81 = arith.constant 0 : index
      %211 = vector.load %arg17[%c0_80, %c0_81] : memref<16x32xf32, #tpu.memory_space<vmem>>, vector<16x32xf32>
      tpu.vector_store %arg17[%c0_80, %c0_81], %210 {strides = array<i32>} : memref<16x32xf32, #tpu.memory_space<vmem>>, vector<16x32xf32>,
    } else {
    }
    %c0 = arith.constant 0 : index
    %c0_1 = arith.constant 0 : index
    %3 = vector.load %arg17[%c0, %c0_1] : memref<16x32xf32, #tpu.memory_space<vmem>>, vector<16x32xf32>
    %c0_2 = arith.constant 0 : index
    %c0_3 = arith.constant 0 : index
    %c0_4 = arith.constant 0 : index
    %4 = vector.load %arg3[%c0_2, %c0_3, %c0_4] : memref<1x1x32xf32, #tpu.memory_space<vmem>>, vector<1x1x32xf32>
    %5 = vector.shape_cast %4 : vector<1x1x32xf32> to vector<1x32xf32>
    %c0_5 = arith.constant 0 : index
    %c0_6 = arith.constant 0 : index
    %c0_7 = arith.constant 0 : index
    %6 = vector.load %arg4[%c0_5, %c0_6, %c0_7] : memref<1x1x32xf32, #tpu.memory_space<vmem>>, vector<1x1x32xf32>
    %7 = vector.shape_cast %6 : vector<1x1x32xf32> to vector<1x32xf32>
    %cst = arith.constant dense<0.000000e+00> : vector<16xf32>
    %8 = vector.multi_reduction <add>, %3, %cst [1] : vector<16x32xf32> to vector<16xf32>
    %9 = vector.shape_cast %8 : vector<16xf32> to vector<16x1xf32>
    %cst_8 = arith.constant 3.200000e+01 : f32
    %10 = vector.broadcast %cst_8 : f32 to vector<16x1xf32>
    %11 = arith.divf %9, %10 : vector<16x1xf32>
    %12 = vector.broadcast %11 : vector<16x1xf32> to vector<16x32xf32>
    %13 = arith.subf %3, %12 : vector<16x32xf32>
    %14 = arith.mulf %13, %13 : vector<16x32xf32>
    %cst_9 = arith.constant dense<0.000000e+00> : vector<16xf32>
    %15 = vector.multi_reduction <add>, %14, %cst_9 [1] : vector<16x32xf32> to vector<16xf32>
    %16 = vector.shape_cast %15 : vector<16xf32> to vector<16x1xf32>
    %cst_10 = arith.constant 3.200000e+01 : f32
    %17 = vector.broadcast %cst_10 : f32 to vector<16x1xf32>
    %18 = arith.divf %16, %17 : vector<16x1xf32>
    %19 = vector.broadcast %11 : vector<16x1xf32> to vector<16x32xf32>
    %20 = arith.subf %3, %19 : vector<16x32xf32>
    %cst_11 = arith.constant 9.99999974E-6 : f32
    %21 = vector.broadcast %cst_11 : f32 to vector<16x1xf32>
    %22 = arith.addf %18, %21 : vector<16x1xf32>
    %23 = math.rsqrt %22 : vector<16x1xf32>
    %24 = vector.broadcast %23 : vector<16x1xf32> to vector<16x32xf32>
    %25 = arith.mulf %20, %24 : vector<16x32xf32>
    %26 = vector.broadcast %5 : vector<1x32xf32> to vector<16x32xf32>
    %27 = arith.mulf %25, %26 : vector<16x32xf32>
    %28 = vector.broadcast %7 : vector<1x32xf32> to vector<16x32xf32>
    %29 = arith.addf %27, %28 : vector<16x32xf32>
    %30 = arith.truncf %29 : vector<16x32xf32> to vector<16x32xbf16>
    %c0_12 = arith.constant 0 : index
    %c0_13 = arith.constant 0 : index
    %c0_14 = arith.constant 0 : index
    %31 = vector.load %arg5[%c0_12, %c0_13, %c0_14] : memref<1x32x96xbf16, #tpu.memory_space<vmem>>, vector<1x32x96xbf16>
    %32 = vector.shape_cast %31 : vector<1x32x96xbf16> to vector<32x96xbf16>
    %cst_15 = arith.constant dense<0.000000e+00> : vector<16x96xf32>
    %33 = tpu.matmul %30, %32, %cst_15 {dimension_numbers = #tpu.dot_dimension_numbers<[1], [0], [0], [1], [0, 0, 1, 1], [], []>} : vector<16x32xbf16>, vector<32x96xbf16>, vector<16x96xf32> -> vector<16x96xf32>
    %c0_16 = arith.constant 0 : index
    %c0_17 = arith.constant 0 : index
    %c0_18 = arith.constant 0 : index
    %34 = vector.load %arg6[%c0_16, %c0_17, %c0_18] : memref<1x1x96xf32, #tpu.memory_space<vmem>>, vector<1x1x96xf32>
    %35 = vector.shape_cast %34 : vector<1x1x96xf32> to vector<1x96xf32>
    %36 = vector.broadcast %35 : vector<1x96xf32> to vector<16x96xf32>
    %37 = arith.addf %33, %36 : vector<16x96xf32>
    %38 = tpu.iota {dimensions = array<i32: 0>} : vector<8x8xi32>
    %39 = tpu.iota {dimensions = array<i32: 1>} : vector<8x8xi32>
    %40 = arith.cmpi sge, %38, %39 : vector<8x8xi32>
    %41 = arith.extui %40 : vector<8x8xi1> to vector<8x8xi32>
    %42 = arith.sitofp %41 : vector<8x8xi32> to vector<8x8xf32>
    %43 = vector.shape_cast %42 : vector<8x8xf32> to vector<1x8x8xf32>
    %44 = vector.shape_cast %43 : vector<1x8x8xf32> to vector<1x8x8xf32>
    %45 = vector.broadcast %44 : vector<1x8x8xf32> to vector<2x8x8xf32>
    %46 = vector.extract_strided_slice %37 {offsets = [0, 0], sizes = [16, 8], strides = [1, 1]} : vector<16x96xf32> to vector<16x8xf32>
    %47 = vector.shape_cast %46 : vector<16x8xf32> to vector<2x8x8xf32>
    %48 = arith.truncf %47 : vector<2x8x8xf32> to vector<2x8x8xbf16>
    %49 = vector.extract_strided_slice %37 {offsets = [0, 32], sizes = [16, 8], strides = [1, 1]} : vector<16x96xf32> to vector<16x8xf32>
    %50 = vector.shape_cast %49 : vector<16x8xf32> to vector<2x8x8xf32>
    %51 = arith.truncf %50 : vector<2x8x8xf32> to vector<2x8x8xbf16>
    %52 = vector.extract_strided_slice %37 {offsets = [0, 64], sizes = [16, 8], strides = [1, 1]} : vector<16x96xf32> to vector<16x8xf32>
    %53 = vector.shape_cast %52 : vector<16x8xf32> to vector<2x8x8xf32>
    %54 = arith.truncf %53 : vector<2x8x8xf32> to vector<2x8x8xbf16>
    "tpu.trace_start"() <{level = 10 : i32, message = "bqd,bkd->bqk"}> : () -> ()
    %cst_19 = arith.constant dense<0.000000e+00> : vector<2x8x8xf32>
    %55 = tpu.matmul %48, %51, %cst_19 {dimension_numbers = #tpu.dot_dimension_numbers<[2], [2], [1], [1], [0, 0, 0, 1, 1, 1], [0], [0]>} : vector<2x8x8xbf16>, vector<2x8x8xbf16>, vector<2x8x8xf32> -> vector<2x8x8xf32>
    "tpu.trace_stop"() : () -> ()
    %56 = arith.addf %55, %45 : vector<2x8x8xf32>
    %cst_20 = arith.constant dense<0xFF800000> : vector<2x8xf32>
    %57 = vector.multi_reduction <maximumf>, %56, %cst_20 [2] : vector<2x8x8xf32> to vector<2x8xf32>
    %58 = vector.shape_cast %57 : vector<2x8xf32> to vector<2x8x1xf32>
    %59 = vector.broadcast %58 : vector<2x8x1xf32> to vector<2x8x8xf32>
    %60 = arith.subf %56, %59 : vector<2x8x8xf32>
    %61 = math.exp %60 : vector<2x8x8xf32>
    %cst_21 = arith.constant dense<0.000000e+00> : vector<2x8xf32>
    %62 = vector.multi_reduction <add>, %61, %cst_21 [2] : vector<2x8x8xf32> to vector<2x8xf32>
    %63 = vector.shape_cast %62 : vector<2x8xf32> to vector<2x8x1xf32>
    %64 = tpu.reciprocal %63 {approx = true} : vector<2x8x1xf32> -> vector<2x8x1xf32>
    %65 = vector.broadcast %64 : vector<2x8x1xf32> to vector<2x8x8xf32>
    %66 = arith.mulf %61, %65 : vector<2x8x8xf32>
    %67 = arith.truncf %66 : vector<2x8x8xf32> to vector<2x8x8xbf16>
    "tpu.trace_start"() <{level = 10 : i32, message = "bqk,bkd->bqd"}> : () -> ()
    %cst_22 = arith.constant dense<0.000000e+00> : vector<2x8x8xf32>
    %68 = tpu.matmul %67, %54, %cst_22 {dimension_numbers = #tpu.dot_dimension_numbers<[2], [1], [1], [2], [0, 0, 0, 1, 1, 2], [0], [0]>} : vector<2x8x8xbf16>, vector<2x8x8xbf16>, vector<2x8x8xf32> -> vector<2x8x8xf32>
    "tpu.trace_stop"() : () -> ()
    %69 = vector.shape_cast %68 : vector<2x8x8xf32> to vector<16x8xf32>
    %70 = arith.truncf %69 : vector<16x8xf32> to vector<16x8xbf16>
    %c0_23 = arith.constant 0 : index
    %c0_24 = arith.constant 0 : index
    %71 = vector.load %arg18[%c0_23, %c0_24] : memref<16x32xbf16, #tpu.memory_space<vmem>>, vector<16x8xbf16>
    tpu.vector_store %arg18[%c0_23, %c0_24], %70 {strides = array<i32>} : memref<16x32xbf16, #tpu.memory_space<vmem>>, vector<16x8xbf16>,
    %72 = vector.extract_strided_slice %37 {offsets = [0, 8], sizes = [16, 8], strides = [1, 1]} : vector<16x96xf32> to vector<16x8xf32>
    %73 = vector.shape_cast %72 : vector<16x8xf32> to vector<2x8x8xf32>
    %74 = arith.truncf %73 : vector<2x8x8xf32> to vector<2x8x8xbf16>
    %75 = vector.extract_strided_slice %37 {offsets = [0, 40], sizes = [16, 8], strides = [1, 1]} : vector<16x96xf32> to vector<16x8xf32>
    %76 = vector.shape_cast %75 : vector<16x8xf32> to vector<2x8x8xf32>
    %77 = arith.truncf %76 : vector<2x8x8xf32> to vector<2x8x8xbf16>
    %78 = vector.extract_strided_slice %37 {offsets = [0, 72], sizes = [16, 8], strides = [1, 1]} : vector<16x96xf32> to vector<16x8xf32>
    %79 = vector.shape_cast %78 : vector<16x8xf32> to vector<2x8x8xf32>
    %80 = arith.truncf %79 : vector<2x8x8xf32> to vector<2x8x8xbf16>
    "tpu.trace_start"() <{level = 10 : i32, message = "bqd,bkd->bqk"}> : () -> ()
    %cst_25 = arith.constant dense<0.000000e+00> : vector<2x8x8xf32>
    %81 = tpu.matmul %74, %77, %cst_25 {dimension_numbers = #tpu.dot_dimension_numbers<[2], [2], [1], [1], [0, 0, 0, 1, 1, 1], [0], [0]>} : vector<2x8x8xbf16>, vector<2x8x8xbf16>, vector<2x8x8xf32> -> vector<2x8x8xf32>
    "tpu.trace_stop"() : () -> ()
    %82 = arith.addf %81, %45 : vector<2x8x8xf32>
    %cst_26 = arith.constant dense<0xFF800000> : vector<2x8xf32>
    %83 = vector.multi_reduction <maximumf>, %82, %cst_26 [2] : vector<2x8x8xf32> to vector<2x8xf32>
    %84 = vector.shape_cast %83 : vector<2x8xf32> to vector<2x8x1xf32>
    %85 = vector.broadcast %84 : vector<2x8x1xf32> to vector<2x8x8xf32>
    %86 = arith.subf %82, %85 : vector<2x8x8xf32>
    %87 = math.exp %86 : vector<2x8x8xf32>
    %cst_27 = arith.constant dense<0.000000e+00> : vector<2x8xf32>
    %88 = vector.multi_reduction <add>, %87, %cst_27 [2] : vector<2x8x8xf32> to vector<2x8xf32>
    %89 = vector.shape_cast %88 : vector<2x8xf32> to vector<2x8x1xf32>
    %90 = tpu.reciprocal %89 {approx = true} : vector<2x8x1xf32> -> vector<2x8x1xf32>
    %91 = vector.broadcast %90 : vector<2x8x1xf32> to vector<2x8x8xf32>
    %92 = arith.mulf %87, %91 : vector<2x8x8xf32>
    %93 = arith.truncf %92 : vector<2x8x8xf32> to vector<2x8x8xbf16>
    "tpu.trace_start"() <{level = 10 : i32, message = "bqk,bkd->bqd"}> : () -> ()
    %cst_28 = arith.constant dense<0.000000e+00> : vector<2x8x8xf32>
    %94 = tpu.matmul %93, %80, %cst_28 {dimension_numbers = #tpu.dot_dimension_numbers<[2], [1], [1], [2], [0, 0, 0, 1, 1, 2], [0], [0]>} : vector<2x8x8xbf16>, vector<2x8x8xbf16>, vector<2x8x8xf32> -> vector<2x8x8xf32>
    "tpu.trace_stop"() : () -> ()
    %95 = vector.shape_cast %94 : vector<2x8x8xf32> to vector<16x8xf32>
    %96 = arith.truncf %95 : vector<16x8xf32> to vector<16x8xbf16>
    %c0_29 = arith.constant 0 : index
    %c8 = arith.constant 8 : index
    %97 = vector.load %arg18[%c0_29, %c8] : memref<16x32xbf16, #tpu.memory_space<vmem>>, vector<16x8xbf16>
    tpu.vector_store %arg18[%c0_29, %c8], %96 {strides = array<i32>} : memref<16x32xbf16, #tpu.memory_space<vmem>>, vector<16x8xbf16>,
    %98 = vector.extract_strided_slice %37 {offsets = [0, 16], sizes = [16, 8], strides = [1, 1]} : vector<16x96xf32> to vector<16x8xf32>
    %99 = vector.shape_cast %98 : vector<16x8xf32> to vector<2x8x8xf32>
    %100 = arith.truncf %99 : vector<2x8x8xf32> to vector<2x8x8xbf16>
    %101 = vector.extract_strided_slice %37 {offsets = [0, 48], sizes = [16, 8], strides = [1, 1]} : vector<16x96xf32> to vector<16x8xf32>
    %102 = vector.shape_cast %101 : vector<16x8xf32> to vector<2x8x8xf32>
    %103 = arith.truncf %102 : vector<2x8x8xf32> to vector<2x8x8xbf16>
    %104 = vector.extract_strided_slice %37 {offsets = [0, 80], sizes = [16, 8], strides = [1, 1]} : vector<16x96xf32> to vector<16x8xf32>
    %105 = vector.shape_cast %104 : vector<16x8xf32> to vector<2x8x8xf32>
    %106 = arith.truncf %105 : vector<2x8x8xf32> to vector<2x8x8xbf16>
    "tpu.trace_start"() <{level = 10 : i32, message = "bqd,bkd->bqk"}> : () -> ()
    %cst_30 = arith.constant dense<0.000000e+00> : vector<2x8x8xf32>
    %107 = tpu.matmul %100, %103, %cst_30 {dimension_numbers = #tpu.dot_dimension_numbers<[2], [2], [1], [1], [0, 0, 0, 1, 1, 1], [0], [0]>} : vector<2x8x8xbf16>, vector<2x8x8xbf16>, vector<2x8x8xf32> -> vector<2x8x8xf32>
    "tpu.trace_stop"() : () -> ()
    %108 = arith.addf %107, %45 : vector<2x8x8xf32>
    %cst_31 = arith.constant dense<0xFF800000> : vector<2x8xf32>
    %109 = vector.multi_reduction <maximumf>, %108, %cst_31 [2] : vector<2x8x8xf32> to vector<2x8xf32>
    %110 = vector.shape_cast %109 : vector<2x8xf32> to vector<2x8x1xf32>
    %111 = vector.broadcast %110 : vector<2x8x1xf32> to vector<2x8x8xf32>
    %112 = arith.subf %108, %111 : vector<2x8x8xf32>
    %113 = math.exp %112 : vector<2x8x8xf32>
    %cst_32 = arith.constant dense<0.000000e+00> : vector<2x8xf32>
    %114 = vector.multi_reduction <add>, %113, %cst_32 [2] : vector<2x8x8xf32> to vector<2x8xf32>
    %115 = vector.shape_cast %114 : vector<2x8xf32> to vector<2x8x1xf32>
    %116 = tpu.reciprocal %115 {approx = true} : vector<2x8x1xf32> -> vector<2x8x1xf32>
    %117 = vector.broadcast %116 : vector<2x8x1xf32> to vector<2x8x8xf32>
    %118 = arith.mulf %113, %117 : vector<2x8x8xf32>
    %119 = arith.truncf %118 : vector<2x8x8xf32> to vector<2x8x8xbf16>
    "tpu.trace_start"() <{level = 10 : i32, message = "bqk,bkd->bqd"}> : () -> ()
    %cst_33 = arith.constant dense<0.000000e+00> : vector<2x8x8xf32>
    %120 = tpu.matmul %119, %106, %cst_33 {dimension_numbers = #tpu.dot_dimension_numbers<[2], [1], [1], [2], [0, 0, 0, 1, 1, 2], [0], [0]>} : vector<2x8x8xbf16>, vector<2x8x8xbf16>, vector<2x8x8xf32> -> vector<2x8x8xf32>
    "tpu.trace_stop"() : () -> ()
    %121 = vector.shape_cast %120 : vector<2x8x8xf32> to vector<16x8xf32>
    %122 = arith.truncf %121 : vector<16x8xf32> to vector<16x8xbf16>
    %c0_34 = arith.constant 0 : index
    %c16 = arith.constant 16 : index
    %123 = vector.load %arg18[%c0_34, %c16] : memref<16x32xbf16, #tpu.memory_space<vmem>>, vector<16x8xbf16>
    tpu.vector_store %arg18[%c0_34, %c16], %122 {strides = array<i32>} : memref<16x32xbf16, #tpu.memory_space<vmem>>, vector<16x8xbf16>,
    %124 = vector.extract_strided_slice %37 {offsets = [0, 24], sizes = [16, 8], strides = [1, 1]} : vector<16x96xf32> to vector<16x8xf32>
    %125 = vector.shape_cast %124 : vector<16x8xf32> to vector<2x8x8xf32>
    %126 = arith.truncf %125 : vector<2x8x8xf32> to vector<2x8x8xbf16>
    %127 = vector.extract_strided_slice %37 {offsets = [0, 56], sizes = [16, 8], strides = [1, 1]} : vector<16x96xf32> to vector<16x8xf32>
    %128 = vector.shape_cast %127 : vector<16x8xf32> to vector<2x8x8xf32>
    %129 = arith.truncf %128 : vector<2x8x8xf32> to vector<2x8x8xbf16>
    %130 = vector.extract_strided_slice %37 {offsets = [0, 88], sizes = [16, 8], strides = [1, 1]} : vector<16x96xf32> to vector<16x8xf32>
    %131 = vector.shape_cast %130 : vector<16x8xf32> to vector<2x8x8xf32>
    %132 = arith.truncf %131 : vector<2x8x8xf32> to vector<2x8x8xbf16>
    "tpu.trace_start"() <{level = 10 : i32, message = "bqd,bkd->bqk"}> : () -> ()
    %cst_35 = arith.constant dense<0.000000e+00> : vector<2x8x8xf32>
    %133 = tpu.matmul %126, %129, %cst_35 {dimension_numbers = #tpu.dot_dimension_numbers<[2], [2], [1], [1], [0, 0, 0, 1, 1, 1], [0], [0]>} : vector<2x8x8xbf16>, vector<2x8x8xbf16>, vector<2x8x8xf32> -> vector<2x8x8xf32>
    "tpu.trace_stop"() : () -> ()
    %134 = arith.addf %133, %45 : vector<2x8x8xf32>
    %cst_36 = arith.constant dense<0xFF800000> : vector<2x8xf32>
    %135 = vector.multi_reduction <maximumf>, %134, %cst_36 [2] : vector<2x8x8xf32> to vector<2x8xf32>
    %136 = vector.shape_cast %135 : vector<2x8xf32> to vector<2x8x1xf32>
    %137 = vector.broadcast %136 : vector<2x8x1xf32> to vector<2x8x8xf32>
    %138 = arith.subf %134, %137 : vector<2x8x8xf32>
    %139 = math.exp %138 : vector<2x8x8xf32>
    %cst_37 = arith.constant dense<0.000000e+00> : vector<2x8xf32>
    %140 = vector.multi_reduction <add>, %139, %cst_37 [2] : vector<2x8x8xf32> to vector<2x8xf32>
    %141 = vector.shape_cast %140 : vector<2x8xf32> to vector<2x8x1xf32>
    %142 = tpu.reciprocal %141 {approx = true} : vector<2x8x1xf32> -> vector<2x8x1xf32>
    %143 = vector.broadcast %142 : vector<2x8x1xf32> to vector<2x8x8xf32>
    %144 = arith.mulf %139, %143 : vector<2x8x8xf32>
    %145 = arith.truncf %144 : vector<2x8x8xf32> to vector<2x8x8xbf16>
    "tpu.trace_start"() <{level = 10 : i32, message = "bqk,bkd->bqd"}> : () -> ()
    %cst_38 = arith.constant dense<0.000000e+00> : vector<2x8x8xf32>
    %146 = tpu.matmul %145, %132, %cst_38 {dimension_numbers = #tpu.dot_dimension_numbers<[2], [1], [1], [2], [0, 0, 0, 1, 1, 2], [0], [0]>} : vector<2x8x8xbf16>, vector<2x8x8xbf16>, vector<2x8x8xf32> -> vector<2x8x8xf32>
    "tpu.trace_stop"() : () -> ()
    %147 = vector.shape_cast %146 : vector<2x8x8xf32> to vector<16x8xf32>
    %148 = arith.truncf %147 : vector<16x8xf32> to vector<16x8xbf16>
    %c0_39 = arith.constant 0 : index
    %c24 = arith.constant 24 : index
    %149 = vector.load %arg18[%c0_39, %c24] : memref<16x32xbf16, #tpu.memory_space<vmem>>, vector<16x8xbf16>
    tpu.vector_store %arg18[%c0_39, %c24], %148 {strides = array<i32>} : memref<16x32xbf16, #tpu.memory_space<vmem>>, vector<16x8xbf16>,
    %c0_40 = arith.constant 0 : index
    %c0_41 = arith.constant 0 : index
    %150 = vector.load %arg18[%c0_40, %c0_41] : memref<16x32xbf16, #tpu.memory_space<vmem>>, vector<16x32xbf16>
    %c0_42 = arith.constant 0 : index
    %c0_43 = arith.constant 0 : index
    %c0_44 = arith.constant 0 : index
    %151 = vector.load %arg7[%c0_42, %c0_43, %c0_44] : memref<1x32x32xbf16, #tpu.memory_space<vmem>>, vector<1x32x32xbf16>
    %152 = vector.shape_cast %151 : vector<1x32x32xbf16> to vector<32x32xbf16>
    %cst_45 = arith.constant dense<0.000000e+00> : vector<16x32xf32>
    %153 = tpu.matmul %150, %152, %cst_45 {dimension_numbers = #tpu.dot_dimension_numbers<[1], [0], [0], [1], [0, 0, 1, 1], [], []>} : vector<16x32xbf16>, vector<32x32xbf16>, vector<16x32xf32> -> vector<16x32xf32>
    %c0_46 = arith.constant 0 : index
    %c0_47 = arith.constant 0 : index
    %c0_48 = arith.constant 0 : index
    %154 = vector.load %arg8[%c0_46, %c0_47, %c0_48] : memref<1x1x32xf32, #tpu.memory_space<vmem>>, vector<1x1x32xf32>
    %155 = vector.shape_cast %154 : vector<1x1x32xf32> to vector<1x32xf32>
    %156 = vector.broadcast %155 : vector<1x32xf32> to vector<16x32xf32>
    %157 = arith.addf %153, %156 : vector<16x32xf32>
    %158 = arith.addf %3, %157 : vector<16x32xf32>
    %c0_49 = arith.constant 0 : index
    %c0_50 = arith.constant 0 : index
    %c0_51 = arith.constant 0 : index
    %159 = vector.load %arg9[%c0_49, %c0_50, %c0_51] : memref<1x1x32xf32, #tpu.memory_space<vmem>>, vector<1x1x32xf32>
    %160 = vector.shape_cast %159 : vector<1x1x32xf32> to vector<1x32xf32>
    %c0_52 = arith.constant 0 : index
    %c0_53 = arith.constant 0 : index
    %c0_54 = arith.constant 0 : index
    %161 = vector.load %arg10[%c0_52, %c0_53, %c0_54] : memref<1x1x32xf32, #tpu.memory_space<vmem>>, vector<1x1x32xf32>
    %162 = vector.shape_cast %161 : vector<1x1x32xf32> to vector<1x32xf32>
    %cst_55 = arith.constant dense<0.000000e+00> : vector<16xf32>
    %163 = vector.multi_reduction <add>, %158, %cst_55 [1] : vector<16x32xf32> to vector<16xf32>
    %164 = vector.shape_cast %163 : vector<16xf32> to vector<16x1xf32>
    %cst_56 = arith.constant 3.200000e+01 : f32
    %165 = vector.broadcast %cst_56 : f32 to vector<16x1xf32>
    %166 = arith.divf %164, %165 : vector<16x1xf32>
    %167 = vector.broadcast %166 : vector<16x1xf32> to vector<16x32xf32>
    %168 = arith.subf %158, %167 : vector<16x32xf32>
    %169 = arith.mulf %168, %168 : vector<16x32xf32>
    %cst_57 = arith.constant dense<0.000000e+00> : vector<16xf32>
    %170 = vector.multi_reduction <add>, %169, %cst_57 [1] : vector<16x32xf32> to vector<16xf32>
    %171 = vector.shape_cast %170 : vector<16xf32> to vector<16x1xf32>
    %cst_58 = arith.constant 3.200000e+01 : f32
    %172 = vector.broadcast %cst_58 : f32 to vector<16x1xf32>
    %173 = arith.divf %171, %172 : vector<16x1xf32>
    %174 = vector.broadcast %166 : vector<16x1xf32> to vector<16x32xf32>
    %175 = arith.subf %158, %174 : vector<16x32xf32>
    %cst_59 = arith.constant 9.99999974E-6 : f32
    %176 = vector.broadcast %cst_59 : f32 to vector<16x1xf32>
    %177 = arith.addf %173, %176 : vector<16x1xf32>
    %178 = math.rsqrt %177 : vector<16x1xf32>
    %179 = vector.broadcast %178 : vector<16x1xf32> to vector<16x32xf32>
    %180 = arith.mulf %175, %179 : vector<16x32xf32>
    %181 = vector.broadcast %160 : vector<1x32xf32> to vector<16x32xf32>
    %182 = arith.mulf %180, %181 : vector<16x32xf32>
    %183 = vector.broadcast %162 : vector<1x32xf32> to vector<16x32xf32>
    %184 = arith.addf %182, %183 : vector<16x32xf32>
    %185 = arith.truncf %184 : vector<16x32xf32> to vector<16x32xbf16>
    %c0_60 = arith.constant 0 : index
    %c0_61 = arith.constant 0 : index
    %c0_62 = arith.constant 0 : index
    %186 = vector.load %arg11[%c0_60, %c0_61, %c0_62] : memref<1x32x128xbf16, #tpu.memory_space<vmem>>, vector<1x32x128xbf16>
    %187 = vector.shape_cast %186 : vector<1x32x128xbf16> to vector<32x128xbf16>
    %cst_63 = arith.constant dense<0.000000e+00> : vector<16x128xf32>
    %188 = tpu.matmul %185, %187, %cst_63 {dimension_numbers = #tpu.dot_dimension_numbers<[1], [0], [0], [1], [0, 0, 1, 1], [], []>} : vector<16x32xbf16>, vector<32x128xbf16>, vector<16x128xf32> -> vector<16x128xf32>
    %c0_64 = arith.constant 0 : index
    %c0_65 = arith.constant 0 : index
    %c0_66 = arith.constant 0 : index
    %189 = vector.load %arg12[%c0_64, %c0_65, %c0_66] : memref<1x1x128xf32, #tpu.memory_space<vmem>>, vector<1x1x128xf32>
    %190 = vector.shape_cast %189 : vector<1x1x128xf32> to vector<1x128xf32>
    %191 = vector.broadcast %190 : vector<1x128xf32> to vector<16x128xf32>
    %192 = arith.addf %188, %191 : vector<16x128xf32>
    %cst_67 = arith.constant 0.000000e+00 : f32
    %193 = vector.broadcast %cst_67 : f32 to vector<16x128xf32>
    %194 = arith.maximumf %192, %193 : vector<16x128xf32>
    %195 = arith.truncf %194 : vector<16x128xf32> to vector<16x128xbf16>
    %c0_68 = arith.constant 0 : index
    %c0_69 = arith.constant 0 : index
    %c0_70 = arith.constant 0 : index
    %196 = vector.load %arg13[%c0_68, %c0_69, %c0_70] : memref<1x128x32xbf16, #tpu.memory_space<vmem>>, vector<1x128x32xbf16>
    %197 = vector.shape_cast %196 : vector<1x128x32xbf16> to vector<128x32xbf16>
    %cst_71 = arith.constant dense<0.000000e+00> : vector<16x32xf32>
    %198 = tpu.matmul %195, %197, %cst_71 {dimension_numbers = #tpu.dot_dimension_numbers<[1], [0], [0], [1], [0, 0, 1, 1], [], []>} : vector<16x128xbf16>, vector<128x32xbf16>, vector<16x32xf32> -> vector<16x32xf32>
    %c0_72 = arith.constant 0 : index
    %c0_73 = arith.constant 0 : index
    %c0_74 = arith.constant 0 : index
    %199 = vector.load %arg14[%c0_72, %c0_73, %c0_74] : memref<1x1x32xf32, #tpu.memory_space<vmem>>, vector<1x1x32xf32>
    %200 = vector.shape_cast %199 : vector<1x1x32xf32> to vector<1x32xf32>
    %201 = vector.broadcast %200 : vector<1x32xf32> to vector<16x32xf32>
    %202 = arith.addf %198, %201 : vector<16x32xf32>
    %203 = arith.addf %158, %202 : vector<16x32xf32>
    %c1_i32 = arith.constant 1 : i32
    %204 = arith.cmpi slt, %arg1, %c1_i32 : i32
    %205 = arith.extui %204 : i1 to i32
    %c0_i32_75 = arith.constant 0 : i32
    %206 = arith.cmpi ne, %205, %c0_i32_75 : i32
    scf.if %206 {
      %c0_78 = arith.constant 0 : index
      %c0_79 = arith.constant 0 : index
      %210 = vector.load %arg17[%c0_78, %c0_79] : memref<16x32xf32, #tpu.memory_space<vmem>>, vector<16x32xf32>
      tpu.vector_store %arg17[%c0_78, %c0_79], %203 {strides = array<i32>} : memref<16x32xf32, #tpu.memory_space<vmem>>, vector<16x32xf32>,
    } else {
    }
    %c1_i32_76 = arith.constant 1 : i32
    %207 = arith.cmpi eq, %arg1, %c1_i32_76 : i32
    %208 = arith.extui %207 : i1 to i32
    %c0_i32_77 = arith.constant 0 : i32
    %209 = arith.cmpi ne, %208, %c0_i32_77 : i32
    scf.if %209 {
      %c0_78 = arith.constant 0 : index
      %c0_79 = arith.constant 0 : index
      %210 = vector.load %arg15[%c0_78, %c0_79] : memref<1x32xf32, #tpu.memory_space<vmem>>, vector<1x32xf32>
      %c0_80 = arith.constant 0 : index
      %c0_81 = arith.constant 0 : index
      %211 = vector.load %arg16[%c0_80, %c0_81] : memref<1x32xf32, #tpu.memory_space<vmem>>, vector<1x32xf32>
      %cst_82 = arith.constant dense<0.000000e+00> : vector<16xf32>
      %212 = vector.multi_reduction <add>, %203, %cst_82 [1] : vector<16x32xf32> to vector<16xf32>
      %213 = vector.shape_cast %212 : vector<16xf32> to vector<16x1xf32>
      %cst_83 = arith.constant 3.200000e+01 : f32
      %214 = vector.broadcast %cst_83 : f32 to vector<16x1xf32>
      %215 = arith.divf %213, %214 : vector<16x1xf32>
      %216 = vector.broadcast %215 : vector<16x1xf32> to vector<16x32xf32>
      %217 = arith.subf %203, %216 : vector<16x32xf32>
      %218 = arith.mulf %217, %217 : vector<16x32xf32>
      %cst_84 = arith.constant dense<0.000000e+00> : vector<16xf32>
      %219 = vector.multi_reduction <add>, %218, %cst_84 [1] : vector<16x32xf32> to vector<16xf32>
      %220 = vector.shape_cast %219 : vector<16xf32> to vector<16x1xf32>
      %cst_85 = arith.constant 3.200000e+01 : f32
      %221 = vector.broadcast %cst_85 : f32 to vector<16x1xf32>
      %222 = arith.divf %220, %221 : vector<16x1xf32>
      %223 = vector.broadcast %215 : vector<16x1xf32> to vector<16x32xf32>
      %224 = arith.subf %203, %223 : vector<16x32xf32>
      %cst_86 = arith.constant 9.99999974E-6 : f32
      %225 = vector.broadcast %cst_86 : f32 to vector<16x1xf32>
      %226 = arith.addf %222, %225 : vector<16x1xf32>
      %227 = math.rsqrt %226 : vector<16x1xf32>
      %228 = vector.broadcast %227 : vector<16x1xf32> to vector<16x32xf32>
      %229 = arith.mulf %224, %228 : vector<16x32xf32>
      %230 = vector.broadcast %210 : vector<1x32xf32> to vector<16x32xf32>
      %231 = arith.mulf %229, %230 : vector<16x32xf32>
      %232 = vector.broadcast %211 : vector<1x32xf32> to vector<16x32xf32>
      %233 = arith.addf %231, %232 : vector<16x32xf32>
      %c0_87 = arith.constant 0 : index
      %c0_88 = arith.constant 0 : index
      %234 = vector.load %arg17[%c0_87, %c0_88] : memref<16x32xf32, #tpu.memory_space<vmem>>, vector<16x32xf32>
      tpu.vector_store %arg17[%c0_87, %c0_88], %233 {strides = array<i32>} : memref<16x32xf32, #tpu.memory_space<vmem>>, vector<16x32xf32>,
    } else {
    }
    return
  }
  func.func @transform_0(%arg0: i32, %arg1: i32) -> (i32, i32) {
    %c0_i32 = arith.constant 0 : i32
    %c0_i32_0 = arith.constant 0 : i32
    return %arg0, %c0_i32 : i32, i32
  }
  func.func @transform_1(%arg0: i32, %arg1: i32) -> (i32, i32, i32) {
    %c0_i32 = arith.constant 0 : i32
    %c0_i32_0 = arith.constant 0 : i32
    %c0_i32_1 = arith.constant 0 : i32
    return %arg1, %c0_i32, %c0_i32_0 : i32, i32, i32
  }
  func.func @transform_2(%arg0: i32, %arg1: i32) -> (i32, i32, i32) {
    %c0_i32 = arith.constant 0 : i32
    %c0_i32_0 = arith.constant 0 : i32
    %c0_i32_1 = arith.constant 0 : i32
    return %arg1, %c0_i32, %c0_i32_0 : i32, i32, i32
  }
  func.func @transform_3(%arg0: i32, %arg1: i32) -> (i32, i32, i32) {
    %c0_i32 = arith.constant 0 : i32
    %c0_i32_0 = arith.constant 0 : i32
    %c0_i32_1 = arith.constant 0 : i32
    return %arg1, %c0_i32, %c0_i32_0 : i32, i32, i32
  }
  func.func @transform_4(%arg0: i32, %arg1: i32) -> (i32, i32, i32) {
    %c0_i32 = arith.constant 0 : i32
    %c0_i32_0 = arith.constant 0 : i32
    %c0_i32_1 = arith.constant 0 : i32
    return %arg1, %c0_i32, %c0_i32_0 : i32, i32, i32
  }
  func.func @transform_5(%arg0: i32, %arg1: i32) -> (i32, i32, i32) {
    %c0_i32 = arith.constant 0 : i32
    %c0_i32_0 = arith.constant 0 : i32
    %c0_i32_1 = arith.constant 0 : i32
    return %arg1, %c0_i32, %c0_i32_0 : i32, i32, i32
  }
  func.func @transform_6(%arg0: i32, %arg1: i32) -> (i32, i32, i32) {
    %c0_i32 = arith.constant 0 : i32
    %c0_i32_0 = arith.constant 0 : i32
    %c0_i32_1 = arith.constant 0 : i32
    return %arg1, %c0_i32, %c0_i32_0 : i32, i32, i32
  }
  func.func @transform_7(%arg0: i32, %arg1: i32) -> (i32, i32, i32) {
    %c0_i32 = arith.constant 0 : i32
    %c0_i32_0 = arith.constant 0 : i32
    %c0_i32_1 = arith.constant 0 : i32
    return %arg1, %c0_i32, %c0_i32_0 : i32, i32, i32
  }
  func.func @transform_8(%arg0: i32, %arg1: i32) -> (i32, i32, i32) {
    %c0_i32 = arith.constant 0 : i32
    %c0_i32_0 = arith.constant 0 : i32
    %c0_i32_1 = arith.constant 0 : i32
    return %arg1, %c0_i32, %c0_i32_0 : i32, i32, i32
  }
  func.func @transform_9(%arg0: i32, %arg1: i32) -> (i32, i32, i32) {
    %c0_i32 = arith.constant 0 : i32
    %c0_i32_0 = arith.constant 0 : i32
    %c0_i32_1 = arith.constant 0 : i32
    return %arg1, %c0_i32, %c0_i32_0 : i32, i32, i32
  }
  func.func @transform_10(%arg0: i32, %arg1: i32) -> (i32, i32, i32) {
    %c0_i32 = arith.constant 0 : i32
    %c0_i32_0 = arith.constant 0 : i32
    %c0_i32_1 = arith.constant 0 : i32
    return %arg1, %c0_i32, %c0_i32_0 : i32, i32, i32
  }
  func.func @transform_11(%arg0: i32, %arg1: i32) -> (i32, i32, i32) {
    %c0_i32 = arith.constant 0 : i32
    %c0_i32_0 = arith.constant 0 : i32
    %c0_i32_1 = arith.constant 0 : i32
    return %arg1, %c0_i32, %c0_i32_0 : i32, i32, i32
  }
  func.func @transform_12(%arg0: i32, %arg1: i32) -> (i32, i32, i32) {
    %c0_i32 = arith.constant 0 : i32
    %c0_i32_0 = arith.constant 0 : i32
    %c0_i32_1 = arith.constant 0 : i32
    return %arg1, %c0_i32, %c0_i32_0 : i32, i32, i32
  }
  func.func @transform_13(%arg0: i32, %arg1: i32) -> (i32, i32) {
    %c0_i32 = arith.constant 0 : i32
    %c0_i32_0 = arith.constant 0 : i32
    %c0_i32_1 = arith.constant 0 : i32
    return %c0_i32, %c0_i32_0 : i32, i32
  }
  func.func @transform_14(%arg0: i32, %arg1: i32) -> (i32, i32) {
    %c0_i32 = arith.constant 0 : i32
    %c0_i32_0 = arith.constant 0 : i32
    %c0_i32_1 = arith.constant 0 : i32
    return %c0_i32, %c0_i32_0 : i32, i32
  }
  func.func @transform_15(%arg0: i32, %arg1: i32) -> (i32, i32) {
    %c0_i32 = arith.constant 0 : i32
    %c0_i32_0 = arith.constant 0 : i32
    return %arg0, %c0_i32 : i32, i32
  }
}

</mosaic_0001>

<bundles_post_ra>
// kernel: tpu_custom_call.1
= control target key start
LH: loop header
LB: loop body
LE: loop exit
PB: predicated region body
PF: predicated region fallthrough
CT: control target
= control target key end

     0   :  { %s3180_s0 = inlined_call_operand.vmem [shape: f32[16,32], index: 0, kind: input, shape index: {}]   ;;  %s3181_s1 = inlined_call_operand.vmem [shape: f32[2,1,32], index: 1, kind: input, shape index: {}]   ;;  %s3182_s2 = inlined_call_operand.vmem [shape: f32[2,1,32], index: 2, kind: input, shape index: {}]   ;;  %s3183_s3 = inlined_call_operand.vmem [shape: bf16[2,32,96], index: 3, kind: input, shape index: {}]   ;;  %s3184_s4 = inlined_call_operand.vmem [shape: f32[2,1,96], index: 4, kind: input, shape index: {}]   ;;  %s3185_s5 = inlined_call_operand.vmem [shape: bf16[2,32,32], index: 5, kind: input, shape index: {}]   ;;  %s3186_s6 = inlined_call_operand.vmem [shape: f32[2,1,32], index: 6, kind: input, shape index: {}]   ;;  %s3187_s7 = inlined_call_operand.vmem [shape: f32[2,1,32], index: 7, kind: input, shape index: {}]   ;;  %s3188_s8 = inlined_call_operand.vmem [shape: f32[2,1,32], index: 8, kind: input, shape index: {}]   ;;  %s3189_s9 = inlined_call_operand.vmem [shape: bf16[2,32,128], index: 9, kind: input, shape index: {}]   ;;  %s3190_s10 = inlined_call_operand.vmem [shape: f32[2,1,128], index: 10, kind: input, shape index: {}]   ;;  %s3191_s11 = inlined_call_operand.vmem [shape: bf16[2,128,32], index: 11, kind: input, shape index: {}]   ;;  %s3192_s12 = inlined_call_operand.vmem [shape: f32[2,1,32], index: 12, kind: input, shape index: {}]   ;;  %s3193_s13 = inlined_call_operand.vmem [shape: f32[1,32], index: 13, kind: input, shape index: {}]   ;;  %s3194_s14 = inlined_call_operand.vmem [shape: f32[1,32], index: 14, kind: input, shape index: {}]   ;;  %s3195_s15 = inlined_call_operand.hbm [shape: f32[16,32], index: 15, kind: output, shape index: {}]  }
   0x1   :  { %3200 = sst [smem:[#allocation10_spill]] %s3183_s3 }
   0x2   :  { %3201 = sst [smem:[#allocation11_spill]] %s3185_s5 }
   0x3   :  { %3202 = sst [smem:[#allocation12_spill]] %s3193_s13 }
   0x4   :  { %3203 = sst [smem:[#allocation13_spill]] %s3194_s14 }
   0x5   :  { %3204 = sst [smem:[#allocation14_spill]] %s3195_s15 }
   0x6   :  { %20 = vsyncpa [#allocation4], 0  ;;  %s2787_s18 = smov 0   ;;  %s2789_s19 = smov 0  }
   0x7   :  { %s2791_s20 = smov 0  }
   0x8 LB: > { %3205 = sst [smem:[#allocation6_spill]] %s2683_s19  ;;  %s35_s22 = sadd.s32 1, %s2683_s19  ;;  %s2687_s20 = sphi %s2791_s20, %s26_s20   ;;  %s2683_s19 = sphi %s2789_s19, %s3224_s19   ;;  %s2679_s18 = sphi %s2787_s18, %s3223_s18  }
   0x9   : > { %3206 = sst [smem:[#allocation7_spill]] %s2687_s20  ;;  %p36_p0 = scmp.ge.s32.totalorder %s35_s22, 2 }
   0xa   : > { %p2275_p1 = scmp.ge.s32.totalorder %s2687_s20, 1  ;;  %p555_p2 = scmp.lt.s32.totalorder %s2687_s20, 3 }
   0xb   : > { %s3226_s22 = smov (%p36_p0, %s35_s22), 0 }
   0xc   : > { %3207 = sst [smem:[#allocation8_spill]] %s3226_s22  ;;  %p556_p3 = pnand %p2275_p1, %p555_p2 }
   0xe   : > { %559 = sbr.rel (%p556_p3) target bundleno = 4513 (0x11a1), region = 80 }
  0x15   : > { %p648_p4 = scmp.lt.s32.totalorder %s2679_s18, 1  ;;  %s3208_s3 = sld [smem:[#allocation10_spill]] }
  0x16   : > { %s3209_s5 = sld [smem:[#allocation11_spill]]  ;;  %p2284_p5 = scmp.ne.s32.totalorder %s2679_s18, 0 }
  0x17   : > { %s2810_s23 = scalar_select %p648_p4, %s2679_s18, 1 }
  0x18   : > { %697 = sbr.rel (%p2284_p5) target bundleno = 31 (0x1f), region = 84  ;;  %v698_v0 = vld [vmem:[%s3180_s0] sm:$0xff] (!%p2284_p5)  ;;  %vm700_vm0 = vcmask (!%p2284_p5), 261120   ;;  %v699_v1 = vld [vmem:[%s3180_s0 + $0x8] sm:$0xff] (!%p2284_p5) }
  0x19   : > { %s2335_s30 = sshll.u32 %s2810_s23, 4  ;;  %s672_s13 = scalar_lea.vmem %s3187_s7, %s2810_s23  ;;  %701 = vst.msk [vmem:[#allocation3] sm:$0xff] (!%p2284_p5), %vm700_vm0, %v698_v0  ;;  %702 = vst.msk [vmem:[#allocation3 + $0x8] sm:$0xff] (!%p2284_p5), %vm700_vm0, %v699_v1 }
  0x1a   : > { %s675_s21 = scalar_lea.vmem %s3188_s8, %s2810_s23  ;;  %s691_s16 = scalar_lea.vmem %s3192_s12, %s2810_s23 }
  0x1b   : > { %s2828_s22 = scalar_lea.vmem %s3208_s3, %s2335_s30  ;;  %s2850_s3 = scalar_lea.vmem %s3189_s9, %s2335_s30 }
  0x1c   : > { %s2833_s20 = scalar_lea.vmem %s3209_s5, %s2335_s30  ;;  %s683_s5 = scalar_lea.vmem %s3190_s10, %s2810_s23 }
  0x1d   : > { %3210 = sst [smem:[#allocation9_spill]] %s2833_s20  ;;  %s2338_s20 = sshll.u32 %s2810_s23, 6 }
  0x1e   : > { %s2860_s27 = scalar_lea.vmem %s3191_s11, %s2338_s20 }
  0x1f PF: > { %vm707_vm1 = vcmask 261120   ;;  %v2577_v16 = vld [vmem:[%s2828_s22] sm:$0xff]   ;;  %v2689_v17 = vmov 0.0   ;;  %v2578_v18 = vld [vmem:[%s2828_s22 + $0x8] sm:$0xff]   ;;  %vm2690_vm2 = vmmov 0   ;;  %s3211_s15 = scalar_lea.vmem %s3181_s1, %s2810_s23  ;;  %s3212_s26 = scalar_lea.vmem %s3182_s2, %s2810_s23  ;;  %vm831_vm3 = vcmask 64512  }
  0x20   : > { %v2873_v2 = vld [vmem:[#allocation3] sm:$0xff]  ;;  %v2875_v3 = vld [vmem:[#allocation3 + $0x8] sm:$0xff]  ;;  %2389 = vmatprep.subr.bf16.mxu0 %v2689_v17  ;;  %2409 = vmatprep.subr.bf16.mxu1 %v2689_v17  ;;  %v2285_v27 = vld [vmem:[%s3211_s15] ss:$0 sm:$0xff]  ;;  %s3213_s17 = scalar_lea.vmem %s3184_s4, %s2810_s23  ;;  %s2691_s30 = smov 96   ;;  %v819_v49 = vlaneseq  ;;  %vm956_vm5 = vcmask 1043456  }
  0x21   : > { %v708_v4 = vsel %vm707_vm1, %v2873_v2, 0.0  ;;  %v711_v5 = vsel %vm707_vm1, %v2875_v3, 0.0  ;;  %2390 = vmatpush3.bf16.msra.mxu0 %v2577_v16  ;;  %2393 = vmatprep.mubr.msk.bf16.mxu0 %vm2690_vm2, %v2689_v17  ;;  %v2286_v31 = vld [vmem:[%s3212_s26] ss:$0 sm:$0xff]  ;;  %s2692_s24 = smov 64   ;;  %s2693_s25 = smov 88  }
  0x22   : > { %709 = vadd.xlane.f32.xlu0 %v708_v4  ;;  %2391 = vmatprep.subr.bf16.mxu0 %v2689_v17  ;;  %v2287_v36 = vld [vmem:[%s3213_s17] ss:$0 sm:$0xff]  ;;  %v820_v50 = vshrl.u32 %v819_v49, 7  ;;  %v822_v51 = vand.u32 127, %v819_v49  ;;  %s2694_s20 = smov 120   ;;  %s2695_s22 = smov 56  }
  0x23   : > { %2411 = vmatprep.mubr.msk.bf16.mxu1 %vm2690_vm2, %v2689_v17  ;;  %s2696_s15 = smov 80   ;;  %s2697_s19 = smov 112   ;;  %vm1275_vm6 = vcmask 130112   ;;  %vm1502_vm7 = vcmask 195712   ;;  %vm1729_vm8 = vcmask 261312  }
  0x24   : > { %vm823_vm4 = vcmp.ge.s32.totalorder %v820_v50, %v822_v51  ;;  %s2698_s14 = smov 48   ;;  %s2699_s26 = smov 72  }
  0x25   : > { %2392 = vmatpush3.bf16.msra.mxu0 %v2578_v18  ;;  %v2932_v52 = vsel %vm823_vm4, 1.0, %v2689_v17  ;;  %s2700_s29 = smov 104   ;;  %s2701_s28 = smov 40  }
  0x26   : > { %712 = vadd.xlane.f32.xlu0 %v711_v5  ;;  %2397 = vmatprep.subr.bf16.mxu0 %v2689_v17  ;;  %s2702_s17 = smov 8   ;;  %p2327_p6 = scmp.ge.s32.totalorder %s2679_s18, 1 }
  0xaf   : > { %v710_v6 = vpop.xlane.xlu0 %709 }
  0xb0   : > { %v715_v7 = vmul.f32 0.03125, %v710_v6 }
  0xb2   : > { %v717_v8 = vsub.f32 %v2873_v2, %v715_v7 }
  0xb3   : > { %v713_v9 = vpop.xlane.xlu0 %712 }
  0xb4   : > { %v716_v10 = vmul.f32 0.03125, %v713_v9  ;;  %v719_v11 = vmul.f32 %v717_v8, %v717_v8 }
  0xb6   : > { %v718_v12 = vsub.f32 %v2875_v3, %v716_v10  ;;  %v721_v13 = vsel %vm707_vm1, %v719_v11, 0.0 }
  0xb7   : > { %722 = vadd.xlane.f32.xlu1 %v721_v13 }
  0xb8   : > { %v720_v14 = vmul.f32 %v718_v12, %v718_v12 }
  0xba   : > { %v724_v15 = vsel %vm707_vm1, %v720_v14, 0.0 }
  0xbb   : > { %725 = vadd.xlane.f32.xlu1 %v724_v15 }
 0x144   : > { %v723_v19 = vpop.xlane.xlu1 %722 }
 0x145   : > { %v727_v20 = vmul.f32 0.03125, %v723_v19 }
 0x147   : > { %v729_v21 = vadd.f32 1e-05, %v727_v20 }
 0x148   : > { %v726_v22 = vpop.xlane.xlu1 %725 }
 0x149   : > { %2591 = vrsqrt.f32 %v729_v21  ;;  %v728_v23 = vmul.f32 0.03125, %v726_v22 }
 0x14b   : > { %v730_v24 = vadd.f32 1e-05, %v728_v23 }
 0x14d   : > { %2593 = vrsqrt.f32 %v730_v24 }
 0x153   : > { %v2592_v25 = vpop.eup %2591 }
 0x154   : > { %v733_v26 = vmul.f32 %v2592_v25, %v717_v8 }
 0x156   : > { %v741_v30 = vmul.f32 %v2285_v27, %v733_v26 }
 0x157   : > { %v2594_v28 = vpop.eup %2593 }
 0x158   : > { %v734_v29 = vmul.f32 %v2594_v28, %v718_v12  ;;  %v749_v33 = vadd.f32 %v2286_v31, %v741_v30 }
 0x15a   : > { %v742_v32 = vmul.f32 %v2285_v27, %v734_v29 }
 0x15c   : > { %v750_v34 = vadd.f32 %v2286_v31, %v742_v32 }
 0x15e   : > { %v751_v35 = vpack.c.bf16 %v750_v34, %v749_v33 }
 0x160   : > { %2394 = vmatmul.mubr.msk.bf16.vlgmr.msra.gmra.mrb[0].mxu0 %vm707_vm1, %v751_v35 }
 0x161   : > { %2399 = vmatprep.mubr.msk.bf16.mxu0 %vm2690_vm2, %v2689_v17 }
 0x233   : > { %v812_v37 = vpop.f32.mrb[0].mxu0 }
 0x234   : > { %v813_v38 = vadd.f32 %v2287_v36, %v812_v37  ;;  %v2395_v39 = vpop.f32.mrb[1].mxu0 }
 0x235   : > { %v815_v40 = vpop.f32.mrb[2].mxu0 }
 0x236   : > { %v2913_v41 = vpack.c.bf16 %v813_v38, %v813_v38  ;;  %v816_v42 = vadd.f32 %v2287_v36, %v815_v40  ;;  %v2396_v43 = vpop.f32.mrb[3].mxu0 }
 0x238   : > { %v2915_v44 = vpack.c.bf16 %v816_v42, %v816_v42  ;;  %829 = vrot.lane.b32.xlu0 %v2913_v41, %s2691_s30 }
 0x23a   : > { %879 = vrot.lane.b32.xlu1 %v2915_v44, %s2691_s30  ;;  %s2703_s30 = smov 16  }
 0x2aa   : > { %v830_v45 = vpop.permute.xlu0 %829 }
 0x2ab   : > { %v836_v46 = vsel %vm831_vm3, %v830_v45, 0 }
 0x2ac   : > { %2398 = vmatpush3.bf16.xpose.msra.mxu0 %v836_v46  ;;  %v880_v47 = vpop.permute.xlu1 %879 }
 0x2ad   : > { %2403 = vmatprep.subr.bf16.mxu0 %v2689_v17  ;;  %v885_v48 = vsel %vm831_vm3, %v880_v47, 0 }
 0x2b3   : > { %2400 = vmatmul.mubr.msk.bf16.vlgmr.msra.gmra.mrb[4].mxu0 %vm831_vm3, %v2913_v41 }
 0x2b4   : > { %2404 = vmatpush3.bf16.xpose.msra.mxu0 %v885_v48  ;;  %2405 = vmatprep.mubr.msk.bf16.mxu0 %vm2690_vm2, %v2689_v17 }
 0x2b5   : > { %2415 = vmatprep.subr.bf16.mxu0 %v2689_v17 }
 0x2bb   : > { %2406 = vmatmul.mubr.msk.bf16.vlgmr.msra.gmra.mrb[8].mxu0 %vm831_vm3, %v2915_v44 }
 0x2bc   : > { %2417 = vmatprep.mubr.msk.bf16.mxu0 %vm2690_vm2, %v2689_v17 }
 0x386   : > { %v872_v53 = vpop.f32.mrb[4].mxu0 }
 0x387   : > { %v873_v54 = vadd.f32 %v2932_v52, %v872_v53  ;;  %v2401_v55 = vpop.f32.mrb[5].mxu0 }
 0x388   : > { %v875_v56 = vpop.f32.mrb[6].mxu0 }
 0x389   : > { %v2402_v57 = vpop.f32.mrb[7].mxu0  ;;  %v927_v58 = vsel %vm831_vm3, %v873_v54, -inf }
 0x38a   : > { %928 = vmax.xlane.f32.xlu1 %v927_v58 }
 0x38e   : > { %v921_v59 = vpop.f32.mrb[8].mxu0 }
 0x38f   : > { %v922_v60 = vadd.f32 %v2932_v52, %v921_v59  ;;  %v2407_v61 = vpop.f32.mrb[9].mxu0 }
 0x390   : > { %v924_v62 = vpop.f32.mrb[10].mxu0 }
 0x391   : > { %v2408_v63 = vpop.f32.mrb[11].mxu0  ;;  %v930_v0 = vsel %vm831_vm3, %v922_v60, -inf }
 0x392   : > { %931 = vmax.xlane.f32.xlu0 %v930_v0 }
 0x39b   : > { %1000 = vrot.lane.b32.xlu1 %v2915_v44, %s2692_s24 }
 0x39f   : > { %1052 = vrot.lane.b32.xlu1 %v2913_v41, %s2693_s25 }
 0x417   : > { %v929_v1 = vpop.xlane.xlu1 %928 }
 0x418   : > { %v933_v4 = vsub.f32 %v873_v54, %v929_v1 }
 0x41a   : > { %v935_v5 = vmul.f32 1.442695, %v933_v4 }
 0x41b   : > { %v1001_v6 = vpop.permute.xlu1 %1000 }
 0x41c   : > { %2595 = vpow2.f32 %v935_v5  ;;  %v1006_v7 = vsel %vm956_vm5, %v1001_v6, 0 }
 0x41d   : > { %2416 = vmatpush3.bf16.msra.mxu0 %v1006_v7 }
 0x41e   : > { %2427 = vmatprep.subr.bf16.mxu0 %v2689_v17 }
 0x41f   : > { %v932_v8 = vpop.xlane.xlu0 %931  ;;  %v1053_v16 = vpop.permute.xlu1 %1052 }
 0x420   : > { %v934_v9 = vsub.f32 %v922_v60, %v932_v8  ;;  %v1058_v24 = vsel %vm831_vm3, %v1053_v16, 0 }
 0x422   : > { %v937_v10 = vmul.f32 1.442695, %v934_v9 }
 0x424   : > { %2597 = vpow2.f32 %v937_v10 }
 0x426   : > { %v2596_v11 = vpop.eup %2595 }
 0x427   : > { %v939_v12 = vsel %vm831_vm3, %v2596_v11, 0.0 }
 0x428   : > { %940 = vadd.xlane.f32.xlu0 %v939_v12 }
 0x42e   : > { %v2598_v13 = vpop.eup %2597 }
 0x42f   : > { %v942_v14 = vsel %vm831_vm3, %v2598_v13, 0.0 }
 0x430   : > { %943 = vadd.xlane.f32.xlu1 %v942_v14 }
 0x43e   : > { %951 = vrot.lane.b32.xlu0 %v2913_v41, %s2692_s24  ;;  %s3214_s24 = sld [smem:[#allocation9_spill]] }
 0x441   : > { %1102 = vrot.lane.b32.xlu1 %v2915_v44, %s2693_s25  ;;  %s2704_s25 = smov 24  }
 0x442   : > { %1050 = vrot.lane.b32.xlu0 %v2913_v41, %s2694_s20 }
 0x445   : > { %1100 = vrot.lane.b32.xlu1 %v2915_v44, %s2694_s20 }
 0x4b5   : > { %v941_v15 = vpop.xlane.xlu0 %940 }
 0x4b6   : > { %2599 = vrcp.f32 %v941_v15 }
 0x4b9   : > { %v952_v18 = vpop.permute.xlu0 %951 }
 0x4ba   : > { %v958_v19 = vsel %vm956_vm5, %v952_v18, 0 }
 0x4bb   : > { %2410 = vmatpush3.bf16.msra.mxu1 %v958_v19 }
 0x4bc   : > { %2421 = vmatprep.subr.bf16.mxu1 %v2689_v17 }
 0x4bd   : > { %v944_v20 = vpop.xlane.xlu1 %943  ;;  %v1051_v29 = vpop.permute.xlu0 %1050 }
 0x4be   : > { %2601 = vrcp.f32 %v944_v20 }
 0x4c0   : > { %v2600_v21 = vpop.eup %2599 }
 0x4c1   : > { %v947_v22 = vmul.f32 %v2600_v21, %v2596_v11  ;;  %v1103_v27 = vpop.permute.xlu1 %1102 }
 0x4c2   : > { %v1108_v30 = vsel %vm831_vm3, %v1103_v27, 0 }
 0x4c3   : > { %v949_v23 = vpack.c.bf16 %v947_v22, %v947_v22 }
 0x4c5   : > { %2412 = vmatmul.mubr.msk.bf16.vlgmr.msra.gmra.mrb[0].mxu1 %vm831_vm3, %v949_v23  ;;  %v1101_v31 = vpop.permute.xlu1 %1100 }
 0x4c6   : > { %2422 = vmatpush3.bf16.xpose.msra.mxu1 %v1058_v24  ;;  %2423 = vmatprep.mubr.msk.bf16.mxu1 %vm2690_vm2, %v2689_v17 }
 0x4c7   : > { %2433 = vmatprep.subr.bf16.mxu1 %v2689_v17 }
 0x4c8   : > { %v2602_v25 = vpop.eup %2601 }
 0x4c9   : > { %v948_v26 = vmul.f32 %v2602_v25, %v2598_v13 }
 0x4cb   : > { %v950_v28 = vpack.c.bf16 %v948_v26, %v948_v26 }
 0x4cd   : > { %2418 = vmatmul.mubr.msk.bf16.vlgmr.msra.gmra.mrb[12].mxu0 %vm831_vm3, %v950_v28  ;;  %2424 = vmatmul.mubr.msk.bf16.vlgmr.msra.gmra.mrb[4].mxu1 %vm831_vm3, %v1051_v29 }
 0x4ce   : > { %2428 = vmatpush3.bf16.xpose.msra.mxu0 %v1108_v30  ;;  %2429 = vmatprep.mubr.msk.bf16.mxu0 %vm2690_vm2, %v2689_v17 }
 0x4cf   : > { %2439 = vmatprep.subr.bf16.mxu0 %v2689_v17  ;;  %2435 = vmatprep.mubr.msk.bf16.mxu1 %vm2690_vm2, %v2689_v17 }
 0x4d5   : > { %2430 = vmatmul.mubr.msk.bf16.vlgmr.msra.gmra.mrb[16].mxu0 %vm831_vm3, %v1101_v31 }
 0x4d6   : > { %2441 = vmatprep.mubr.msk.bf16.mxu0 %vm2690_vm2, %v2689_v17 }
 0x598   : > { %v994_v32 = vpop.f32.mrb[0].mxu1 }
 0x599   : > { %v2413_v33 = vpop.f32.mrb[1].mxu1 }
 0x59a   : > { %v997_v34 = vpop.f32.mrb[2].mxu1 }
 0x59b   : > { %v2414_v35 = vpop.f32.mrb[3].mxu1 }
 0x5a0   : > { %v1042_v36 = vpop.f32.mrb[12].mxu0  ;;  %v1094_v37 = vpop.f32.mrb[4].mxu1 }
 0x5a1   : > { %v1048_v38 = vpack.c.bf16 %v1042_v36, %v994_v32  ;;  %v1095_v39 = vadd.f32 %v2932_v52, %v1094_v37  ;;  %v2419_v40 = vpop.f32.mrb[13].mxu0  ;;  %v2425_v42 = vpop.f32.mrb[5].mxu1 }
 0x5a2   : > { %v1045_v43 = vpop.f32.mrb[14].mxu0  ;;  %v1097_v45 = vpop.f32.mrb[6].mxu1 }
 0x5a3   : > { %1049 = vst.msk [vmem:[#allocation2] sm:$0xff] %vm831_vm3, %v1048_v38  ;;  %v2420_v46 = vpop.f32.mrb[15].mxu0  ;;  %v2426_v47 = vpop.f32.mrb[7].mxu1  ;;  %v1150_v48 = vsel %vm831_vm3, %v1095_v39, -inf }
 0x5a4   : > { %1151 = vmax.xlane.f32.xlu0 %v1150_v48 }
 0x5a8   : > { %v1144_v49 = vpop.f32.mrb[16].mxu0 }
 0x5a9   : > { %v1145_v50 = vadd.f32 %v2932_v52, %v1144_v49  ;;  %v2431_v51 = vpop.f32.mrb[17].mxu0 }
 0x5aa   : > { %v1147_v53 = vpop.f32.mrb[18].mxu0 }
 0x5ab   : > { %v2432_v54 = vpop.f32.mrb[19].mxu0  ;;  %v1153_v55 = vsel %vm831_vm3, %v1145_v50, -inf }
 0x5ac   : > { %1154 = vmax.xlane.f32.xlu1 %v1153_v55 }
 0x5bd   : > { %1222 = vrot.lane.b32.xlu1 %v2915_v44, %s2695_s22 }
 0x5c1   : > { %1279 = vrot.lane.b32.xlu1 %v2913_v41, %s2696_s15 }
 0x5c5   : > { %1329 = vrot.lane.b32.xlu1 %v2915_v44, %s2696_s15  ;;  %s3215_s15 = scalar_lea.vmem %s3186_s6, %s2810_s23 }
 0x5c9   : > { %1327 = vrot.lane.b32.xlu1 %v2915_v44, %s2697_s19 }
 0x631   : > { %v1152_v56 = vpop.xlane.xlu0 %1151 }
 0x632   : > { %v1156_v57 = vsub.f32 %v1095_v39, %v1152_v56 }
 0x634   : > { %v1158_v58 = vmul.f32 1.442695, %v1156_v57 }
 0x636   : > { %2603 = vpow2.f32 %v1158_v58 }
 0x639   : > { %v1155_v59 = vpop.xlane.xlu1 %1154 }
 0x63a   : > { %v1157_v60 = vsub.f32 %v1145_v50, %v1155_v59 }
 0x63c   : > { %v1160_v61 = vmul.f32 1.442695, %v1157_v60 }
 0x63d   : > { %v1223_v62 = vpop.permute.xlu1 %1222 }
 0x63e   : > { %2605 = vpow2.f32 %v1160_v61  ;;  %v1228_v63 = vsel %vm956_vm5, %v1223_v62, 0 }
 0x63f   : > { %2440 = vmatpush3.bf16.msra.mxu0 %v1228_v63 }
 0x640   : > { %v2604_v0 = vpop.eup %2603  ;;  %2451 = vmatprep.subr.bf16.mxu0 %v2689_v17 }
 0x641   : > { %v1162_v1 = vsel %vm831_vm3, %v2604_v0, 0.0  ;;  %v1280_v13 = vpop.permute.xlu1 %1279 }
 0x642   : > { %1163 = vadd.xlane.f32.xlu0 %v1162_v1  ;;  %v1285_v18 = vsel %vm831_vm3, %v1280_v13, 0 }
 0x645   : > { %v1330_v16 = vpop.permute.xlu1 %1329 }
 0x646   : > { %v1335_v20 = vsel %vm831_vm3, %v1330_v16, 0 }
 0x648   : > { %v2606_v4 = vpop.eup %2605 }
 0x649   : > { %v1165_v5 = vsel %vm831_vm3, %v2606_v4, 0.0  ;;  %v1328_v22 = vpop.permute.xlu1 %1327 }
 0x64a   : > { %1166 = vadd.xlane.f32.xlu0 %v1165_v5 }
 0x660   : > { %1174 = vrot.lane.b32.xlu0 %v2913_v41, %s2695_s22 }
 0x664   : > { %1277 = vrot.lane.b32.xlu0 %v2913_v41, %s2697_s19 }
 0x6cf   : > { %v1164_v6 = vpop.xlane.xlu0 %1163 }
 0x6d0   : > { %2607 = vrcp.f32 %v1164_v6 }
 0x6d7   : > { %v1167_v7 = vpop.xlane.xlu0 %1166 }
 0x6d8   : > { %2609 = vrcp.f32 %v1167_v7 }
 0x6da   : > { %v2608_v8 = vpop.eup %2607 }
 0x6db   : > { %v1170_v9 = vmul.f32 %v2608_v8, %v2604_v0  ;;  %v1175_v10 = vpop.permute.xlu0 %1174 }
 0x6dc   : > { %v1180_v11 = vsel %vm956_vm5, %v1175_v10, 0 }
 0x6dd   : > { %2434 = vmatpush3.bf16.msra.mxu1 %v1180_v11  ;;  %v1172_v12 = vpack.c.bf16 %v1170_v9, %v1170_v9 }
 0x6de   : > { %2445 = vmatprep.subr.bf16.mxu1 %v2689_v17 }
 0x6df   : > { %v1278_v21 = vpop.permute.xlu0 %1277 }
 0x6e0   : > { %2436 = vmatmul.mubr.msk.bf16.vlgmr.msra.gmra.mrb[8].mxu1 %vm831_vm3, %v1172_v12 }
 0x6e1   : > { %2447 = vmatprep.mubr.msk.bf16.mxu1 %vm2690_vm2, %v2689_v17 }
 0x6e2   : > { %v2610_v14 = vpop.eup %2609 }
 0x6e3   : > { %v1171_v15 = vmul.f32 %v2610_v14, %v2606_v4 }
 0x6e5   : > { %v1173_v19 = vpack.c.bf16 %v1171_v15, %v1171_v15 }
 0x6e6   : > { %2446 = vmatpush3.bf16.xpose.msra.mxu1 %v1285_v18 }
 0x6e7   : > { %2442 = vmatmul.mubr.msk.bf16.vlgmr.msra.gmra.mrb[20].mxu0 %vm831_vm3, %v1173_v19  ;;  %2457 = vmatprep.subr.bf16.mxu1 %v2689_v17 }
 0x6e8   : > { %2452 = vmatpush3.bf16.xpose.msra.mxu0 %v1335_v20  ;;  %2453 = vmatprep.mubr.msk.bf16.mxu0 %vm2690_vm2, %v2689_v17 }
 0x6e9   : > { %2463 = vmatprep.subr.bf16.mxu0 %v2689_v17 }
 0x6ed   : > { %2448 = vmatmul.mubr.msk.bf16.vlgmr.msra.gmra.mrb[12].mxu1 %vm831_vm3, %v1278_v21 }
 0x6ee   : > { %2459 = vmatprep.mubr.msk.bf16.mxu1 %vm2690_vm2, %v2689_v17 }
 0x6ef   : > { %2454 = vmatmul.mubr.msk.bf16.vlgmr.msra.gmra.mrb[24].mxu0 %vm831_vm3, %v1328_v22 }
 0x6f0   : > { %2465 = vmatprep.mubr.msk.bf16.mxu0 %vm2690_vm2, %v2689_v17 }
 0x7b3   : > { %v2999_v23 = vpop.f32.mrb[8].mxu1 }
 0x7b4   : > { %v2437_v24 = vpop.f32.mrb[9].mxu1 }
 0x7b5   : > { %v1219_v25 = vpop.f32.mrb[10].mxu1 }
 0x7b6   : > { %v2438_v26 = vpop.f32.mrb[11].mxu1 }
 0x7ba   : > { %v3001_v27 = vpop.f32.mrb[20].mxu0 }
 0x7bb   : > { %v1270_v28 = vpack.c.bf16 %v3001_v27, %v2999_v23  ;;  %v2443_v29 = vpop.f32.mrb[21].mxu0 }
 0x7bc   : > { %v1267_v30 = vpop.f32.mrb[22].mxu0 }
 0x7bd   : > { %v2444_v31 = vpop.f32.mrb[23].mxu0 }
 0x7c0   : > { %v1321_v32 = vpop.f32.mrb[12].mxu1 }
 0x7c1   : > { %v1322_v33 = vadd.f32 %v2932_v52, %v1321_v32  ;;  %v2449_v34 = vpop.f32.mrb[13].mxu1 }
 0x7c2   : > { %v1324_v35 = vpop.f32.mrb[14].mxu1  ;;  %v1371_v36 = vpop.f32.mrb[24].mxu0 }
 0x7c3   : > { %v1372_v37 = vadd.f32 %v2932_v52, %v1371_v36  ;;  %v2450_v38 = vpop.f32.mrb[15].mxu1  ;;  %v2455_v39 = vpop.f32.mrb[25].mxu0  ;;  %v1377_v40 = vsel %vm831_vm3, %v1322_v33, -inf }
 0x7c4   : > { %1378 = vmax.xlane.f32.xlu0 %v1377_v40  ;;  %v1374_v42 = vpop.f32.mrb[26].mxu0 }
 0x7c5   : > { %v2456_v43 = vpop.f32.mrb[27].mxu0  ;;  %v1380_v45 = vsel %vm831_vm3, %v1372_v37, -inf }
 0x7c6   : > { %1381 = vmax.xlane.f32.xlu1 %v1380_v45 }
 0x7d7   : > { %1449 = vrot.lane.b32.xlu1 %v2915_v44, %s2698_s14 }
 0x7db   : > { %1506 = vrot.lane.b32.xlu1 %v2913_v41, %s2699_s26 }
 0x7df   : > { %1556 = vrot.lane.b32.xlu1 %v2915_v44, %s2699_s26 }
 0x7e3   : > { %1554 = vrot.lane.b32.xlu1 %v2915_v44, %s2700_s29 }
 0x851   : > { %v1379_v46 = vpop.xlane.xlu0 %1378 }
 0x852   : > { %v1383_v47 = vsub.f32 %v1322_v33, %v1379_v46 }
 0x853   : > { %v1382_v48 = vpop.xlane.xlu1 %1381 }
 0x854   : > { %v1385_v49 = vmul.f32 1.442695, %v1383_v47  ;;  %v1384_v50 = vsub.f32 %v1372_v37, %v1382_v48 }
 0x856   : > { %2611 = vpow2.f32 %v1385_v49  ;;  %v1387_v51 = vmul.f32 1.442695, %v1384_v50 }
 0x857   : > { %v1450_v53 = vpop.permute.xlu1 %1449 }
 0x858   : > { %2613 = vpow2.f32 %v1387_v51  ;;  %v1455_v54 = vsel %vm956_vm5, %v1450_v53, 0 }
 0x859   : > { %2464 = vmatpush3.bf16.msra.mxu0 %v1455_v54 }
 0x85a   : > { %2475 = vmatprep.subr.bf16.mxu0 %v2689_v17 }
 0x85b   : > { %v1507_v0 = vpop.permute.xlu1 %1506 }
 0x85c   : > { %v1512_v8 = vsel %vm831_vm3, %v1507_v0, 0 }
 0x85f   : > { %v1557_v7 = vpop.permute.xlu1 %1556 }
 0x860   : > { %v2612_v55 = vpop.eup %2611  ;;  %v1562_v10 = vsel %vm831_vm3, %v1557_v7, 0 }
 0x861   : > { %v1389_v56 = vsel %vm831_vm3, %v2612_v55, 0.0 }
 0x862   : > { %v2614_v57 = vpop.eup %2613  ;;  %1390 = vadd.xlane.f32.xlu0 %v1389_v56 }
 0x863   : > { %v1392_v58 = vsel %vm831_vm3, %v2614_v57, 0.0  ;;  %v1555_v12 = vpop.permute.xlu1 %1554 }
 0x866   : > { %1393 = vadd.xlane.f32.xlu0 %v1392_v58 }
 0x87c   : > { %1401 = vrot.lane.b32.xlu0 %v2913_v41, %s2698_s14 }
 0x880   : > { %1504 = vrot.lane.b32.xlu0 %v2913_v41, %s2700_s29 }
 0x8ef   : > { %v1391_v59 = vpop.xlane.xlu0 %1390 }
 0x8f0   : > { %2615 = vrcp.f32 %v1391_v59  ;;  %v2579_v59 = vld [vmem:[%s3214_s24] sm:$0xff]  }
 0x8f3   : > { %v1394_v60 = vpop.xlane.xlu0 %1393 }
 0x8f4   : > { %2617 = vrcp.f32 %v1394_v60  ;;  %v2580_v60 = vld [vmem:[%s3214_s24 + $0x8] sm:$0xff]  }
 0x8f7   : > { %v1402_v61 = vpop.permute.xlu0 %1401 }
 0x8f8   : > { %v1407_v62 = vsel %vm956_vm5, %v1402_v61, 0 }
 0x8f9   : > { %2458 = vmatpush3.bf16.msra.mxu1 %v1407_v62 }
 0x8fa   : > { %v2616_v63 = vpop.eup %2615  ;;  %2469 = vmatprep.subr.bf16.mxu1 %v2689_v17 }
 0x8fb   : > { %v1397_v1 = vmul.f32 %v2616_v63, %v2612_v55  ;;  %v1505_v11 = vpop.permute.xlu0 %1504 }
 0x8fd   : > { %v1399_v4 = vpack.c.bf16 %v1397_v1, %v1397_v1 }
 0x8fe   : > { %v2618_v5 = vpop.eup %2617 }
 0x8ff   : > { %v1398_v6 = vmul.f32 %v2618_v5, %v2614_v57  ;;  %2460 = vmatmul.mubr.msk.bf16.vlgmr.msra.gmra.mrb[16].mxu1 %vm831_vm3, %v1399_v4 }
 0x900   : > { %2471 = vmatprep.mubr.msk.bf16.mxu1 %vm2690_vm2, %v2689_v17 }
 0x901   : > { %v1400_v9 = vpack.c.bf16 %v1398_v6, %v1398_v6 }
 0x902   : > { %2470 = vmatpush3.bf16.xpose.msra.mxu1 %v1512_v8 }
 0x903   : > { %2466 = vmatmul.mubr.msk.bf16.vlgmr.msra.gmra.mrb[28].mxu0 %vm831_vm3, %v1400_v9  ;;  %2481 = vmatprep.subr.bf16.mxu1 %v2689_v17 }
 0x904   : > { %2476 = vmatpush3.bf16.xpose.msra.mxu0 %v1562_v10  ;;  %2477 = vmatprep.mubr.msk.bf16.mxu0 %vm2690_vm2, %v2689_v17  ;;  %v2308_v10 = vld [vmem:[%s3215_s15] ss:$0 sm:$0xff] }
 0x905   : > { %2487 = vmatprep.subr.bf16.mxu0 %v2689_v17 }
 0x909   : > { %2472 = vmatmul.mubr.msk.bf16.vlgmr.msra.gmra.mrb[20].mxu1 %vm831_vm3, %v1505_v11 }
 0x90a   : > { %2483 = vmatprep.mubr.msk.bf16.mxu1 %vm2690_vm2, %v2689_v17 }
 0x90b   : > { %2478 = vmatmul.mubr.msk.bf16.vlgmr.msra.gmra.mrb[32].mxu0 %vm831_vm3, %v1555_v12 }
 0x90c   : > { %2489 = vmatprep.mubr.msk.bf16.mxu0 %vm2690_vm2, %v2689_v17 }
 0x9d2   : > { %v1443_v13 = vpop.f32.mrb[16].mxu1 }
 0x9d3   : > { %v2461_v14 = vpop.f32.mrb[17].mxu1 }
 0x9d4   : > { %v1446_v15 = vpop.f32.mrb[18].mxu1 }
 0x9d5   : > { %v2462_v16 = vpop.f32.mrb[19].mxu1 }
 0x9d6   : > { %v1491_v18 = vpop.f32.mrb[28].mxu0 }
 0x9d7   : > { %v1497_v19 = vpack.c.bf16 %v1491_v18, %v1443_v13  ;;  %v2467_v20 = vpop.f32.mrb[29].mxu0 }
 0x9d8   : > { %v1494_v21 = vpop.f32.mrb[30].mxu0 }
 0x9d9   : > { %v2468_v22 = vpop.f32.mrb[31].mxu0 }
 0x9dc   : > { %v1548_v24 = vpop.f32.mrb[20].mxu1 }
 0x9dd   : > { %v1549_v25 = vadd.f32 %v2932_v52, %v1548_v24  ;;  %v2473_v26 = vpop.f32.mrb[21].mxu1 }
 0x9de   : > { %v1551_v29 = vpop.f32.mrb[22].mxu1  ;;  %v1598_v30 = vpop.f32.mrb[32].mxu0 }
 0x9df   : > { %v1599_v31 = vadd.f32 %v2932_v52, %v1598_v30  ;;  %v2474_v32 = vpop.f32.mrb[23].mxu1  ;;  %v2479_v33 = vpop.f32.mrb[33].mxu0  ;;  %v1604_v34 = vsel %vm831_vm3, %v1549_v25, -inf }
 0x9e0   : > { %1605 = vmax.xlane.f32.xlu0 %v1604_v34  ;;  %v1601_v35 = vpop.f32.mrb[34].mxu0  ;;  %v2581_v33 = vld [vmem:[%s2850_s3] sm:$0xff]   ;;  %v2582_v34 = vld [vmem:[%s2850_s3 + $0x8] sm:$0xff]  }
 0x9e1   : > { %v2480_v36 = vpop.f32.mrb[35].mxu0  ;;  %v1607_v37 = vsel %vm831_vm3, %v1599_v31, -inf  ;;  %v2583_v35 = vld [vmem:[%s2860_s27] sm:$0xff]  }
 0x9e2   : > { %1608 = vmax.xlane.f32.xlu1 %v1607_v37  ;;  %v2584_v36 = vld [vmem:[%s2860_s27 + $0x8] sm:$0xff]   ;;  %v2585_v37 = vld [vmem:[%s2860_s27 + $0x10] sm:$0xff]  }
 0x9f3   : > { %1676 = vrot.lane.b32.xlu1 %v2915_v44, %s2701_s28 }
 0x9f7   : > { %1272 = vrot.lane.b32.xlu1 %v1270_v28, %s2702_s17 }
 0x9fb   : > { %1499 = vrot.lane.b32.xlu1 %v1497_v19, %s2703_s30 }
 0xa6d   : > { %v1606_v52 = vpop.xlane.xlu0 %1605 }
 0xa6e   : > { %v1610_v38 = vsub.f32 %v1549_v25, %v1606_v52  ;;  %v2586_v52 = vld [vmem:[%s2860_s27 + $0x18] sm:$0xff]  }
 0xa6f   : > { %v1609_v39 = vpop.xlane.xlu1 %1608 }
 0xa70   : > { %v1612_v40 = vmul.f32 1.442695, %v1610_v38  ;;  %v1611_v42 = vsub.f32 %v1599_v31, %v1609_v39  ;;  %v2587_v38 = vld [vmem:[%s2860_s27 + $0x20] sm:$0xff]   ;;  %v2588_v39 = vld [vmem:[%s2860_s27 + $0x28] sm:$0xff]  }
 0xa72   : > { %2619 = vpow2.f32 %v1612_v40  ;;  %v1614_v43 = vmul.f32 1.442695, %v1611_v42 }
 0xa73   : > { %v1677_v45 = vpop.permute.xlu1 %1676 }
 0xa74   : > { %2621 = vpow2.f32 %v1614_v43  ;;  %v1682_v46 = vsel %vm956_vm5, %v1677_v45, 0 }
 0xa75   : > { %2488 = vmatpush3.bf16.msra.mxu0 %v1682_v46 }
 0xa76   : > { %2501 = vmatprep.subr.bf16.mxu0 %v2689_v17 }
 0xa77   : > { %v1273_v44 = vpop.permute.xlu1 %1272 }
 0xa78   : > { %1276 = vst.msk [vmem:[#allocation2] sm:$0xff] %vm1275_vm6, %v1273_v44 }
 0xa7b   : > { %v1500_v23 = vpop.permute.xlu1 %1499 }
 0xa7c   : > { %v2620_v27 = vpop.eup %2619  ;;  %1503 = vst.msk [vmem:[#allocation2] sm:$0xff] %vm1502_vm7, %v1500_v23 }
 0xa7d   : > { %v1616_v28 = vsel %vm831_vm3, %v2620_v27, 0.0 }
 0xa7e   : > { %v2622_v47 = vpop.eup %2621  ;;  %1617 = vadd.xlane.f32.xlu0 %v1616_v28  ;;  %v2312_v28 = vld [vmem:[%s672_s13] ss:$0 sm:$0xff] }
 0xa7f   : > { %v1619_v48 = vsel %vm831_vm3, %v2622_v47, 0.0 }
 0xa82   : > { %1620 = vadd.xlane.f32.xlu0 %v1619_v48 }
 0xa98   : > { %1628 = vrot.lane.b32.xlu0 %v2913_v41, %s2701_s28 }
 0xb0b   : > { %v1618_v49 = vpop.xlane.xlu0 %1617 }
 0xb0c   : > { %2623 = vrcp.f32 %v1618_v49 }
 0xb0f   : > { %v1621_v50 = vpop.xlane.xlu0 %1620 }
 0xb10   : > { %2625 = vrcp.f32 %v1621_v50  ;;  %v2313_v50 = vld [vmem:[%s675_s21] ss:$0 sm:$0xff] }
 0xb13   : > { %v1629_v51 = vpop.permute.xlu0 %1628 }
 0xb14   : > { %v1634_v53 = vsel %vm956_vm5, %v1629_v51, 0 }
 0xb15   : > { %2482 = vmatpush3.bf16.msra.mxu1 %v1634_v53 }
 0xb16   : > { %v2624_v54 = vpop.eup %2623  ;;  %2493 = vmatprep.subr.bf16.mxu1 %v2689_v17 }
 0xb17   : > { %v1624_v55 = vmul.f32 %v2624_v54, %v2620_v27 }
 0xb19   : > { %v1626_v56 = vpack.c.bf16 %v1624_v55, %v1624_v55 }
 0xb1a   : > { %v2626_v57 = vpop.eup %2625 }
 0xb1b   : > { %v1625_v58 = vmul.f32 %v2626_v57, %v2622_v47  ;;  %2484 = vmatmul.mubr.msk.bf16.vlgmr.msra.gmra.mrb[24].mxu1 %vm831_vm3, %v1626_v56  ;;  %v2589_v56 = vld [vmem:[%s2860_s27 + $0x30] sm:$0xff]   ;;  %v2590_v57 = vld [vmem:[%s2860_s27 + $0x38] sm:$0xff]  }
 0xb1c   : > { %2497 = vmatprep.mubr.msk.bf16.mxu1 %vm2690_vm2, %v2689_v17  ;;  %2494 = vmatpush3.bf16.msra.mxu1 %v2579_v59 }
 0xb1d   : > { %v1627_v41 = vpack.c.bf16 %v1625_v58, %v1625_v58  ;;  %2495 = vmatprep.subr.bf16.mxu1 %v2689_v17  ;;  %v2314_v58 = vld [vmem:[%s683_s5] ss:$0 sm:$0xff] }
 0xb1f   : > { %2490 = vmatmul.mubr.msk.bf16.vlgmr.msra.gmra.mrb[36].mxu0 %vm831_vm3, %v1627_v41 }
 0xb20   : > { %2505 = vmatprep.mubr.msk.bf16.mxu0 %vm2690_vm2, %v2689_v17  ;;  %2496 = vmatpush3.bf16.msra.mxu1 %v2580_v60 }
 0xb21   : > { %2509 = vmatprep.subr.bf16.mxu1 %v2689_v17  ;;  %2502 = vmatpush3.bf16.msra.mxu0 %v2581_v33 }
 0xb22   : > { %2503 = vmatprep.subr.bf16.mxu0 %v2689_v17 }
 0xb25   : > { %2504 = vmatpush3.bf16.msra.mxu0 %v2582_v34 }
 0xbee   : > { %v1670_v61 = vpop.f32.mrb[24].mxu1 }
 0xbef   : > { %v2485_v62 = vpop.f32.mrb[25].mxu1 }
 0xbf0   : > { %v1673_v63 = vpop.f32.mrb[26].mxu1 }
 0xbf1   : > { %v2486_v0 = vpop.f32.mrb[27].mxu1 }
 0xbf2   : > { %v1718_v1 = vpop.f32.mrb[36].mxu0 }
 0xbf3   : > { %v1724_v4 = vpack.c.bf16 %v1718_v1, %v1670_v61  ;;  %v2491_v5 = vpop.f32.mrb[37].mxu0 }
 0xbf4   : > { %v1721_v6 = vpop.f32.mrb[38].mxu0 }
 0xbf5   : > { %1726 = vrot.lane.b32.xlu0 %v1724_v4, %s2704_s25  ;;  %v2492_v7 = vpop.f32.mrb[39].mxu0 }
 0xc67   : > { %v1727_v8 = vpop.permute.xlu0 %1726 }
 0xc68   : > { %1730 = vst.msk [vmem:[#allocation2] sm:$0xff] %vm1729_vm8, %v1727_v8 }
 0xc6f   : > { %v1731_v9 = vld [vmem:[#allocation2] sm:$0xff] }
 0xc70   : > { %2498 = vmatmul.mubr.msk.bf16.vlgmr.msra.gmra.mrb[28].mxu1 %vm707_vm1, %v1731_v9 }
 0xc71   : > { %2525 = vmatprep.mubr.msk.bf16.mxu1 %vm2690_vm2, %v2689_v17  ;;  %2510 = vmatpush3.bf16.msra.mxu1 %v2583_v35 }
 0xc72   : > { %2511 = vmatprep.subr.bf16.mxu1 %v2689_v17 }
 0xc75   : > { %2512 = vmatpush3.bf16.msra.mxu1 %v2584_v36 }
 0xc76   : > { %2513 = vmatprep.subr.bf16.mxu1 %v2689_v17 }
 0xc79   : > { %2514 = vmatpush3.bf16.msra.mxu1 %v2585_v37 }
 0xc7a   : > { %2515 = vmatprep.subr.bf16.mxu1 %v2689_v17 }
 0xc7d   : > { %2516 = vmatpush3.bf16.msra.mxu1 %v2586_v52 }
 0xc7e   : > { %2517 = vmatprep.subr.bf16.mxu1 %v2689_v17 }
 0xc81   : > { %2518 = vmatpush3.bf16.msra.mxu1 %v2587_v38 }
 0xc82   : > { %2519 = vmatprep.subr.bf16.mxu1 %v2689_v17 }
 0xc85   : > { %2520 = vmatpush3.bf16.msra.mxu1 %v2588_v39 }
 0xc86   : > { %2521 = vmatprep.subr.bf16.mxu1 %v2689_v17 }
 0xc89   : > { %2522 = vmatpush3.bf16.msra.mxu1 %v2589_v56 }
 0xc8a   : > { %2523 = vmatprep.subr.bf16.mxu1 %v2689_v17  ;;  %v2318_v17 = vld [vmem:[%s691_s16] ss:$0 sm:$0xff] }
 0xc8d   : > { %2524 = vmatpush3.bf16.msra.mxu1 %v2590_v57 }
 0xd43   : > { %v1792_v11 = vpop.f32.mrb[28].mxu1 }
 0xd44   : > { %v1793_v12 = vadd.f32 %v2308_v10, %v1792_v11  ;;  %v2499_v13 = vpop.f32.mrb[29].mxu1 }
 0xd45   : > { %v1795_v14 = vpop.f32.mrb[30].mxu1 }
 0xd46   : > { %v3072_v15 = vadd.f32 %v1793_v12, %v2873_v2  ;;  %v1796_v16 = vadd.f32 %v2308_v10, %v1795_v14  ;;  %v2500_v18 = vpop.f32.mrb[31].mxu1 }
 0xd48   : > { %v3075_v19 = vadd.f32 %v1796_v16, %v2875_v3  ;;  %v1803_v20 = vsel %vm707_vm1, %v3072_v15, 0.0 }
 0xd49   : > { %1804 = vadd.xlane.f32.xlu1 %v1803_v20 }
 0xd4a   : > { %v1806_v21 = vsel %vm707_vm1, %v3075_v19, 0.0 }
 0xd4b   : > { %1807 = vadd.xlane.f32.xlu0 %v1806_v21 }
 0xdd6   : > { %v1805_v22 = vpop.xlane.xlu1 %1804 }
 0xdd7   : > { %v1809_v24 = vmul.f32 0.03125, %v1805_v22 }
 0xdd8   : > { %v1808_v2 = vpop.xlane.xlu0 %1807 }
 0xdd9   : > { %v1811_v25 = vsub.f32 %v3072_v15, %v1809_v24  ;;  %v1810_v26 = vmul.f32 0.03125, %v1808_v2 }
 0xddb   : > { %v1812_v3 = vsub.f32 %v3075_v19, %v1810_v26  ;;  %v1813_v29 = vmul.f32 %v1811_v25, %v1811_v25 }
 0xddd   : > { %v1815_v30 = vsel %vm707_vm1, %v1813_v29, 0.0  ;;  %v1814_v31 = vmul.f32 %v1812_v3, %v1812_v3 }
 0xdde   : > { %1816 = vadd.xlane.f32.xlu0 %v1815_v30 }
 0xddf   : > { %v1818_v32 = vsel %vm707_vm1, %v1814_v31, 0.0 }
 0xde2   : > { %1819 = vadd.xlane.f32.xlu0 %v1818_v32 }
 0xe6b   : > { %v1817_v40 = vpop.xlane.xlu0 %1816 }
 0xe6c   : > { %v1821_v42 = vmul.f32 0.03125, %v1817_v40 }
 0xe6e   : > { %v1823_v43 = vadd.f32 1e-05, %v1821_v42 }
 0xe6f   : > { %v1820_v45 = vpop.xlane.xlu0 %1819 }
 0xe70   : > { %2627 = vrsqrt.f32 %v1823_v43  ;;  %v1822_v46 = vmul.f32 0.03125, %v1820_v45 }
 0xe72   : > { %v1824_v44 = vadd.f32 1e-05, %v1822_v46 }
 0xe74   : > { %2629 = vrsqrt.f32 %v1824_v44 }
 0xe7a   : > { %v2628_v23 = vpop.eup %2627 }
 0xe7b   : > { %v1827_v27 = vmul.f32 %v2628_v23, %v1811_v25 }
 0xe7d   : > { %v1835_v48 = vmul.f32 %v2312_v28, %v1827_v27 }
 0xe7e   : > { %v2630_v47 = vpop.eup %2629 }
 0xe7f   : > { %v1828_v49 = vmul.f32 %v2630_v47, %v1812_v3  ;;  %v1843_v53 = vadd.f32 %v2313_v50, %v1835_v48 }
 0xe81   : > { %v1836_v51 = vmul.f32 %v2312_v28, %v1828_v49 }
 0xe83   : > { %v1844_v54 = vadd.f32 %v2313_v50, %v1836_v51 }
 0xe85   : > { %v1845_v55 = vpack.c.bf16 %v1844_v54, %v1843_v53 }
 0xe87   : > { %2506 = vmatmul.mubr.msk.bf16.vlgmr.msra.gmra.mrb[40].mxu0 %vm707_vm1, %v1845_v55 }
 0xf5a   : > { %v1906_v41 = vpop.f32.mrb[40].mxu0 }
 0xf5b   : > { %v1907_v59 = vadd.f32 %v2314_v58, %v1906_v41  ;;  %v2507_v60 = vpop.f32.mrb[41].mxu0 }
 0xf5c   : > { %v1909_v61 = vpop.f32.mrb[42].mxu0 }
 0xf5d   : > { %v1910_v62 = vadd.f32 %v2314_v58, %v1909_v61  ;;  %v2508_v63 = vpop.f32.mrb[43].mxu0  ;;  %v1913_v0 = vmax.f32 %v1907_v59, 0.0 }
 0xf5f   : > { %v1914_v1 = vmax.f32 %v1910_v62, 0.0 }
 0xf61   : > { %v1915_v4 = vpack.c.bf16 %v1914_v1, %v1913_v0 }
 0xf63   : > { %2526 = vmatmul.mubr.bf16.vlgmr.msra.gmra.mrb[32].mxu1 %v1915_v4 }
0x1035   : > { %2033 = sbr.rel (%p2327_p6) target bundleno = 4158 (0x103e), region = 88 }
0x1036   : > { %v2021_v5 = vpop.f32.mrb[32].mxu1 }
0x1037   : > { %v2022_v6 = vadd.f32 %v2318_v17, %v2021_v5  ;;  %v2527_v7 = vpop.f32.mrb[33].mxu1 }
0x1038   : > { %v2024_v8 = vpop.f32.mrb[34].mxu1 }
0x1039   : > { %v2028_v9 = vadd.f32 %v2022_v6, %v3072_v15  ;;  %v2025_v10 = vadd.f32 %v2318_v17, %v2024_v8  ;;  %v2528_v11 = vpop.f32.mrb[35].mxu1 }
0x103b   : > { %v2029_v12 = vadd.f32 %v2025_v10, %v3075_v19  ;;  %2034 = vst.msk [vmem:[#allocation3] sm:$0xff] (!%p2327_p6), %vm707_vm1, %v2028_v9 }
0x103d   : > { %2035 = vst.msk [vmem:[#allocation3 + $0x8] sm:$0xff] %vm707_vm1, %v2029_v12 }
0x103e PF: > { %p2328_p7 = scmp.ne.s32.totalorder %s2679_s18, 1 }
0x103f   : > { %v2042_v13 = vsel (!%p2328_p7), %vm707_vm1, %v2028_v9, 0.0  ;;  %v2045_v14 = vsel (!%p2328_p7), %vm707_vm1, %v2029_v12, 0.0  ;;  %s3216_s23 = sld [smem:[#allocation12_spill]] (!%p2328_p7)  ;;  %s3217_s30 = sld [smem:[#allocation13_spill]] (!%p2328_p7) }
0x1040   : > { %2039 = sbr.rel (%p2328_p7) target bundleno = 4477 (0x117d), region = 92  ;;  %2043 = vadd.xlane.f32.xlu0 (!%p2328_p7), %v2042_v13 }
0x1044   : > { %2046 = vadd.xlane.f32.xlu0 (!%p2328_p7), %v2045_v14 }
0x1045   : > { %v2329_v34 = vld [vmem:[%s3216_s23] ss:$0 sm:$0xff] (!%p2328_p7) }
0x1046   : > { %v2330_v36 = vld [vmem:[%s3217_s30] ss:$0 sm:$0xff] (!%p2328_p7) }
0x10cd   : > { %v2044_v15 = vpop.xlane.xlu0 %2043 }
0x10ce   : > { %v2048_v16 = vmul.f32 0.03125, %v2044_v15 }
0x10d0   : > { %v2050_v18 = vsub.f32 %v2028_v9, %v2048_v16 }
0x10d1   : > { %v2047_v19 = vpop.xlane.xlu0 %2046 }
0x10d2   : > { %v2049_v20 = vmul.f32 0.03125, %v2047_v19  ;;  %v2052_v21 = vmul.f32 %v2050_v18, %v2050_v18 }
0x10d4   : > { %v2051_v22 = vsub.f32 %v2029_v12, %v2049_v20  ;;  %v2054_v24 = vsel %vm707_vm1, %v2052_v21, 0.0 }
0x10d5   : > { %2055 = vadd.xlane.f32.xlu1 %v2054_v24 }
0x10d6   : > { %v2053_v2 = vmul.f32 %v2051_v22, %v2051_v22 }
0x10d8   : > { %v2057_v25 = vsel %vm707_vm1, %v2053_v2, 0.0 }
0x10d9   : > { %2058 = vadd.xlane.f32.xlu1 %v2057_v25 }
0x1162   : > { %v2056_v26 = vpop.xlane.xlu1 %2055 }
0x1163   : > { %v2060_v3 = vmul.f32 0.03125, %v2056_v26 }
0x1165   : > { %v2062_v29 = vadd.f32 1e-05, %v2060_v3 }
0x1166   : > { %v2059_v30 = vpop.xlane.xlu1 %2058 }
0x1167   : > { %2631 = vrsqrt.f32 %v2062_v29  ;;  %v2061_v31 = vmul.f32 0.03125, %v2059_v30 }
0x1169   : > { %v2063_v32 = vadd.f32 1e-05, %v2061_v31 }
0x116b   : > { %2633 = vrsqrt.f32 %v2063_v32 }
0x1171   : > { %v2632_v33 = vpop.eup %2631 }
0x1172   : > { %v2066_v35 = vmul.f32 %v2632_v33, %v2050_v18 }
0x1174   : > { %v2074_v37 = vmul.f32 %v2329_v34, %v2066_v35 }
0x1175   : > { %v2634_v52 = vpop.eup %2633 }
0x1176   : > { %v2082_v38 = vadd.f32 %v2330_v36, %v2074_v37  ;;  %v2067_v39 = vmul.f32 %v2634_v52, %v2051_v22 }
0x1178   : > { %2084 = vst.msk [vmem:[#allocation3] sm:$0xff] %vm707_vm1, %v2082_v38  ;;  %v2075_v40 = vmul.f32 %v2329_v34, %v2067_v39 }
0x117a   : > { %v2083_v42 = vadd.f32 %v2330_v36, %v2075_v40 }
0x117c   : > { %2085 = vst.msk [vmem:[#allocation3 + $0x8] sm:$0xff] %vm707_vm1, %v2083_v42 }
0x117d PF: > { %s3218_s24 = sld [smem:[#allocation7_spill]]  ;;  %s2705_s22 = smov [#allocation3]  }
0x117e   : > { %s2095_s15 = sshll.u32 %s2705_s22, 4  ;;  %s2096_s15 = int_to_ptr.vmem [resolvable:$true] %s2095_s15 }
0x117f   : > { %s2635_s3 = scalar_lea.vmem %s2096_s15, 256  ;;  %p2642_p12 = scmp.lt.s32.totalorder %s2096_s15, %s2096_s15 }
0x1180   : > { %p2636_p9 = scmp.ne.s32.totalorder %s2096_s15, %s2635_s3  ;;  %p2643_p13 = scmp.lt.s32.totalorder %s2635_s3, %s2635_s3 }
0x1182   : > { %p2644_p0 = por %p2643_p13, %p2642_p12 }
0x1183   : > { %s3219_s25 = sadd.s32 4294967295, %s3218_s24  }
0x1184   : > { %p3144_p8 = scmp.eq.s32.totalorder %s3219_s25, 1 }
0x1186   : > { %p2637_p10 = pnand %p2636_p9, %p3144_p8 }
0x1188   : > { %p2638_p11 = pneg %p2637_p10 }
0x118a   : > { %p2645_p1 = pnand %p2644_p0, %p2638_p11 }
0x118c   : > { %2648 = shalt.err (!%p2645_p1)
}
0x118d   : > { %s3221_s26 = sld [smem:[#allocation14_spill]] }
0x1193   : > { %s2649_s13 = scalar_lea.hbm %s3221_s26, 256 }
0x1194   : > { %p2650_p2 = scmp.ne.s32.totalorder %s3221_s26, %s2649_s13  ;;  %p2655_p5 = scmp.lt.u32.totalorder %s2649_s13, %s3221_s26 }
0x1196   : > { %p2651_p3 = pnand %p2650_p2, %p3144_p8 }
0x1198   : > { %p2652_p4 = pneg %p2651_p3 }
0x119a   : > { %p2657_p6 = pnand %p2655_p5, %p2652_p4 }
0x119c   : > { %2660 = shalt.err (!%p2657_p6)
}
0x119d   : > { %s2706_s18 = smov 128  }
0x119e   : > { %2530 = dma.vmem_to_hbm [thread:$0]  (%p3144_p8), %s2096_s15, 256, %s3221_s26, [#allocation4], %s2706_s18, %s2706_s18, %s2702_s17  }
0x119f   : > { %2674 = dma.done.wait (%p3144_p8), [#allocation4], 256  }
0x11a0   : > { %2676 = vsyncadd (%p3144_p8), [#allocation4], 4294967040 }
0x11a1 PF: > { %s3222_s16 = sld [smem:[#allocation7_spill]]  ;;  %s3223_s18 = sld [smem:[#allocation6_spill]] }
0x11a2   : > { %s3224_s19 = sld [smem:[#allocation8_spill]] }
0x11a7   : > { %s26_s20 = sadd.s32 1, %s3222_s16  }
0x11a8   : > { %p23_p7 = scmp.ge.s32.totalorder %s26_s20, 4  }
0x11aa   :  { %25 = sbr.rel (!%p23_p7) target bundleno = 8 (0x8), region = 156 }
0x11b1   :  { %2111 = vsyncpa [#allocation4], 1 }
0x11b2   :  { %2113 = vsyncpa [#allocation4 + $0x1], 1 }

</bundles_post_ra>
